<compile_context>
chip_gen: v5e
topology: v5e:2x2
jax: 0.10.0
libtpu: 0.0.40
codegen_flags: <defaults>
</compile_context>

<pallas_src>
import jax
import jax.numpy as jnp
from jax.experimental import pallas as pl
from jax.experimental.pallas import tpu as pltpu


def _round_up(x: int, m: int) -> int:
    return (x + m - 1) // m * m


def query_encoder_kernel(x_ref, w1_ref, b1_ref, w2_ref, b2_ref, o_ref):
    # Layer 1: Conv1d(k=1) == matmul; bias + ReLU in f32.
    h = jnp.dot(x_ref[...], w1_ref[...], preferred_element_type=jnp.float32)
    h = jnp.maximum(h + b1_ref[...], 0.0)
    # Cast only if the second weight matrix has a different (e.g. bf16) dtype.
    if h.dtype != w2_ref.dtype:
        h = h.astype(w2_ref.dtype)
    # Layer 2: Conv1d(k=1) == matmul; bias + ReLU in f32.
    o = jnp.dot(h, w2_ref[...], preferred_element_type=jnp.float32)
    o = jnp.maximum(o + b2_ref[...], 0.0)
    o_ref[...] = o.astype(o_ref.dtype)


def query_encoder(x, w1, b1, w2, b2, *, batch_tile=512):
    """Fused QueryEncoder forward.

    x : (B, C_in)
    w1: (C_in, C_hid)   b1: (1, C_hid)
    w2: (C_hid, C_out)  b2: (1, C_out)
    returns (B, C_out)
    """
    B, C_in = x.shape
    C_hid = w1.shape[1]
    C_out = w2.shape[1]

    # --- Lane-pad hidden / output channel dims to multiples of 128 -----------
    # Zero padding is exact: padded hidden units get bias 0 -> ReLU -> 0, and
    # the matching rows of w2 are zero, so padded channels contribute nothing.
    C_hid_p = _round_up(C_hid, 128)
    C_out_p = _round_up(C_out, 128)
    if C_hid_p != C_hid:
        w1 = jnp.pad(w1, ((0, 0), (0, C_hid_p - C_hid)))
        b1 = jnp.pad(b1, ((0, 0), (0, C_hid_p - C_hid)))
        w2 = jnp.pad(w2, ((0, C_hid_p - C_hid), (0, 0)))
    if C_out_p != C_out:
        w2 = jnp.pad(w2, ((0, 0), (0, C_out_p - C_out)))
        b2 = jnp.pad(b2, ((0, 0), (0, C_out_p - C_out)))

    # --- Tile the batch dimension --------------------------------------------
    # Large tiles amortize per-step overhead; weights stay resident in VMEM.
    TB = min(batch_tile, _round_up(B, 8))
    B_p = _round_up(B, TB)
    if B_p != B:
        x = jnp.pad(x, ((0, B_p - B), (0, 0)))

    grid = (B_p // TB,)

    out = pl.pallas_call(
        query_encoder_kernel,
        out_shape=jax.ShapeDtypeStruct((B_p, C_out_p), x.dtype),
        grid_spec=pl.GridSpec(
            grid=grid,
            in_specs=[
                pl.BlockSpec((TB, C_in), lambda i: (i, 0)),        # x: tiled over batch
                pl.BlockSpec((C_in, C_hid_p), lambda i: (0, 0)),   # w1: resident
                pl.BlockSpec((1, C_hid_p), lambda i: (0, 0)),      # b1: resident
                pl.BlockSpec((C_hid_p, C_out_p), lambda i: (0, 0)),# w2: resident
                pl.BlockSpec((1, C_out_p), lambda i: (0, 0)),      # b2: resident
            ],
            out_specs=pl.BlockSpec((TB, C_out_p), lambda i: (i, 0)),
        ),
        compiler_params=pltpu.CompilerParams(
            dimension_semantics=("parallel",)),
    )(x, w1, b1, w2, b2)

    # Drop batch / lane padding.
    return out[:B, :C_out]


def _reference(x, w1, b1, w2, b2):
    h = jnp.maximum(x @ w1 + b1, 0.0)
    return jnp.maximum(h @ w2 + b2, 0.0)


def _make_params(key, c_in, c_hid, c_out, dtype=jnp.float32):
    kw1, kb1, kw2, kb2 = jax.random.split(key, 4)
    # PyTorch Conv1d weight is (out, in, 1); build (out, in), transpose to (in, out).
    w1_oi = jax.random.normal(kw1, (c_hid, c_in), dtype=dtype) * (1.0 / c_in ** 0.5)
    b1 = jax.random.normal(kb1, (1, c_hid), dtype=dtype) * 0.1
    w2_oi = jax.random.normal(kw2, (c_out, c_hid), dtype=dtype) * (1.0 / c_hid ** 0.5)
    b2 = jax.random.normal(kb2, (1, c_out), dtype=dtype) * 0.1
    return w1_oi.T, b1, w2_oi.T, b2


if __name__ == "__main__":
    key = jax.random.PRNGKey(0)
    k1, k2, k3, k4 = jax.random.split(key, 4)

    # Case 1: module-default channel widths (768 -> 512 -> 256), small batch.
    B, C_IN, C_HID, C_OUT = 16, 768, 512, 256
    x = jax.random.normal(k1, (B, C_IN), dtype=jnp.float32)
    w1, b1, w2, b2 = _make_params(k2, C_IN, C_HID, C_OUT)
    out = jax.block_until_ready(query_encoder(x, w1, b1, w2, b2))
    ref = _reference(x, w1, b1, w2, b2)
    assert out.shape == (B, C_OUT)
    assert jnp.allclose(out, ref, atol=1e-4, rtol=1e-4)

    # Case 2: non-lane-aligned channels / ragged batch to exercise the padding path.
    B2, C_IN2, C_HID2, C_OUT2 = 10, 96, 80, 40
    x2 = jax.random.normal(k3, (B2, C_IN2), dtype=jnp.float32)
    w1b, b1b, w2b, b2b = _make_params(k4, C_IN2, C_HID2, C_OUT2)
    out2 = jax.block_until_ready(query_encoder(x2, w1b, b1b, w2b, b2b))
    ref2 = _reference(x2, w1b, b1b, w2b, b2b)
    assert out2.shape == (B2, C_OUT2)
    assert jnp.allclose(out2, ref2, atol=1e-4, rtol=1e-4)

    print("KERNEL_OK")
</pallas_src>

<mosaic_0001>
module attributes {stable_mosaic.version = 11 : i64} {
  func.func @query_encoder_kernel(%arg0: i32, %arg1: memref<16x768xf32, #tpu.memory_space<vmem>>, %arg2: memref<768x512xf32, #tpu.memory_space<vmem>>, %arg3: memref<1x512xf32, #tpu.memory_space<vmem>>, %arg4: memref<512x256xf32, #tpu.memory_space<vmem>>, %arg5: memref<1x256xf32, #tpu.memory_space<vmem>>, %arg6: memref<16x256xf32, #tpu.memory_space<vmem>>) attributes {dimension_semantics = [#tpu.dimension_semantics<parallel>], iteration_bounds = array<i64: 1>, scalar_prefetch = 0 : i64, scratch_operands = 0 : i64, tpu.core_type = #tpu.core_type<tc>, window_params = [{transform_indices = @transform_0, window_bounds = array<i64: 16, 768>}, {pipeline_mode = #tpu.pipeline_mode<synchronous>, transform_indices = @transform_1, window_bounds = array<i64: 768, 512>}, {pipeline_mode = #tpu.pipeline_mode<synchronous>, transform_indices = @transform_2, window_bounds = array<i64: 1, 512>}, {pipeline_mode = #tpu.pipeline_mode<synchronous>, transform_indices = @transform_3, window_bounds = array<i64: 512, 256>}, {pipeline_mode = #tpu.pipeline_mode<synchronous>, transform_indices = @transform_4, window_bounds = array<i64: 1, 256>}, {transform_indices = @transform_5, window_bounds = array<i64: 16, 256>}]} {
    %c0 = arith.constant 0 : index
    %c0_0 = arith.constant 0 : index
    %0 = vector.load %arg1[%c0, %c0_0] : memref<16x768xf32, #tpu.memory_space<vmem>>, vector<16x768xf32>
    %c0_1 = arith.constant 0 : index
    %c0_2 = arith.constant 0 : index
    %1 = vector.load %arg2[%c0_1, %c0_2] : memref<768x512xf32, #tpu.memory_space<vmem>>, vector<768x512xf32>
    %cst = arith.constant dense<0.000000e+00> : vector<16x512xf32>
    %2 = tpu.matmul %0, %1, %cst {dimension_numbers = #tpu.dot_dimension_numbers<[1], [0], [0], [1], [0, 0, 1, 1], [], []>} : vector<16x768xf32>, vector<768x512xf32>, vector<16x512xf32> -> vector<16x512xf32>
    %c0_3 = arith.constant 0 : index
    %c0_4 = arith.constant 0 : index
    %3 = vector.load %arg3[%c0_3, %c0_4] : memref<1x512xf32, #tpu.memory_space<vmem>>, vector<1x512xf32>
    %4 = vector.broadcast %3 : vector<1x512xf32> to vector<16x512xf32>
    %5 = arith.addf %2, %4 : vector<16x512xf32>
    %cst_5 = arith.constant 0.000000e+00 : f32
    %6 = vector.broadcast %cst_5 : f32 to vector<16x512xf32>
    %7 = arith.maximumf %5, %6 : vector<16x512xf32>
    %c0_6 = arith.constant 0 : index
    %c0_7 = arith.constant 0 : index
    %8 = vector.load %arg4[%c0_6, %c0_7] : memref<512x256xf32, #tpu.memory_space<vmem>>, vector<512x256xf32>
    %cst_8 = arith.constant dense<0.000000e+00> : vector<16x256xf32>
    %9 = tpu.matmul %7, %8, %cst_8 {dimension_numbers = #tpu.dot_dimension_numbers<[1], [0], [0], [1], [0, 0, 1, 1], [], []>} : vector<16x512xf32>, vector<512x256xf32>, vector<16x256xf32> -> vector<16x256xf32>
    %c0_9 = arith.constant 0 : index
    %c0_10 = arith.constant 0 : index
    %10 = vector.load %arg5[%c0_9, %c0_10] : memref<1x256xf32, #tpu.memory_space<vmem>>, vector<1x256xf32>
    %11 = vector.broadcast %10 : vector<1x256xf32> to vector<16x256xf32>
    %12 = arith.addf %9, %11 : vector<16x256xf32>
    %cst_11 = arith.constant 0.000000e+00 : f32
    %13 = vector.broadcast %cst_11 : f32 to vector<16x256xf32>
    %14 = arith.maximumf %12, %13 : vector<16x256xf32>
    %c0_12 = arith.constant 0 : index
    %c0_13 = arith.constant 0 : index
    %15 = vector.load %arg6[%c0_12, %c0_13] : memref<16x256xf32, #tpu.memory_space<vmem>>, vector<16x256xf32>
    tpu.vector_store %arg6[%c0_12, %c0_13], %14 {strides = array<i32>} : memref<16x256xf32, #tpu.memory_space<vmem>>, vector<16x256xf32>,
    return
  }
  func.func @transform_0(%arg0: i32) -> (i32, i32) {
    %c0_i32 = arith.constant 0 : i32
    %c0_i32_0 = arith.constant 0 : i32
    return %arg0, %c0_i32 : i32, i32
  }
  func.func @transform_1(%arg0: i32) -> (i32, i32) {
    %c0_i32 = arith.constant 0 : i32
    %c0_i32_0 = arith.constant 0 : i32
    %c0_i32_1 = arith.constant 0 : i32
    return %c0_i32, %c0_i32_0 : i32, i32
  }
  func.func @transform_2(%arg0: i32) -> (i32, i32) {
    %c0_i32 = arith.constant 0 : i32
    %c0_i32_0 = arith.constant 0 : i32
    %c0_i32_1 = arith.constant 0 : i32
    return %c0_i32, %c0_i32_0 : i32, i32
  }
  func.func @transform_3(%arg0: i32) -> (i32, i32) {
    %c0_i32 = arith.constant 0 : i32
    %c0_i32_0 = arith.constant 0 : i32
    %c0_i32_1 = arith.constant 0 : i32
    return %c0_i32, %c0_i32_0 : i32, i32
  }
  func.func @transform_4(%arg0: i32) -> (i32, i32) {
    %c0_i32 = arith.constant 0 : i32
    %c0_i32_0 = arith.constant 0 : i32
    %c0_i32_1 = arith.constant 0 : i32
    return %c0_i32, %c0_i32_0 : i32, i32
  }
  func.func @transform_5(%arg0: i32) -> (i32, i32) {
    %c0_i32 = arith.constant 0 : i32
    %c0_i32_0 = arith.constant 0 : i32
    return %arg0, %c0_i32 : i32, i32
  }
}

</mosaic_0001>

<bundles_post_ra>
// kernel: tpu_custom_call.1
= control target key start
LH: loop header
LB: loop body
LE: loop exit
PB: predicated region body
PF: predicated region fallthrough
CT: control target
= control target key end

     0   :  { %10 = vsyncpa [#allocation3], 0  ;;  %s1780_s0 = inlined_call_operand.hbm [shape: f32[16,768], index: 0, kind: input, shape index: {}]   ;;  %s1781_s1 = inlined_call_operand.hbm [shape: f32[768,512], index: 1, kind: input, shape index: {}]   ;;  %s1782_s2 = inlined_call_operand.hbm [shape: f32[1,512], index: 2, kind: input, shape index: {}]   ;;  %s1783_s3 = inlined_call_operand.hbm [shape: f32[512,256], index: 3, kind: input, shape index: {}]   ;;  %s1784_s4 = inlined_call_operand.hbm [shape: f32[1,256], index: 4, kind: input, shape index: {}]   ;;  %s1785_s5 = inlined_call_operand.hbm [shape: f32[16,256], index: 5, kind: output, shape index: {}]  }
   0x1   :  { %11 = vsyncpa [#allocation6], 0 }
   0x2   :  { %12 = vsyncpa [#allocation9], 0  ;;  %s31_s20 = sshll.u32 %s1781_s1, 4  ;;  %s32_s20 = int_to_ptr.hbm [resolvable:$true] %s31_s20 }
   0x3   :  { %13 = vsyncpa [#allocation4], 0  ;;  %s1582_s21 = smov [#allocation5]   ;;  %s55_s25 = sshll.u32 %s1783_s3, 4  ;;  %s56_s25 = int_to_ptr.hbm [resolvable:$true] %s55_s25 }
   0x4   :  { %s33_s22 = sshll.u32 %s1582_s21, 4  ;;  %s1583_s26 = smov 512   ;;  %s34_s22 = int_to_ptr.vmem [resolvable:$true] %s33_s22 }
   0x5   :  { %s1584_s27 = smov 32   ;;  %s1585_s28 = smov [#allocation8]  }
   0x6   :  { %39 = dma.hbm_to_vmem [thread:$0]  %s32_s20, 49152, %s34_s22, [#allocation6], %s1583_s26, %s1583_s26, %s1584_s27  }
   0x7   :  { %s57_s29 = sshll.u32 %s1585_s28, 4  ;;  %s1586_s30 = smov 256   ;;  %s58_s29 = int_to_ptr.vmem [resolvable:$true] %s57_s29 }
   0x8   :  { %s1587_s6 = smov 16   ;;  %s18_s8 = sshll.u32 %s1780_s0, 4  ;;  %s19_s8 = int_to_ptr.hbm [resolvable:$true] %s18_s8 }
   0x9   :  { %63 = dma.hbm_to_vmem [thread:$0]  %s56_s25, 16384, %s58_s29, [#allocation9], %s1586_s30, %s1586_s30, %s1587_s6  }
   0xa   :  { %s1588_s9 = smov [#allocation2]   ;;  %s45_s12 = sshll.u32 %s1782_s2, 4  ;;  %s46_s12 = int_to_ptr.hbm [resolvable:$true] %s45_s12 }
   0xb   :  { %s20_s3 = sshll.u32 %s1588_s9, 4  ;;  %s1589_s13 = smov 768   ;;  %s21_s3 = int_to_ptr.vmem [resolvable:$true] %s20_s3 }
   0xc   :  { %s1590_s14 = smov 48   ;;  %s1591_s15 = smov [#allocation7]  }
   0xd   :  { %26 = dma.hbm_to_vmem [thread:$0]  %s19_s8, 1536, %s21_s3, [#allocation3], %s1589_s13, %s1589_s13, %s1590_s14  }
   0xe   :  { %s47_s16 = sshll.u32 %s1591_s15, 4  ;;  %s69_s19 = sshll.u32 %s1784_s4, 4  ;;  %s48_s16 = int_to_ptr.vmem [resolvable:$true] %s47_s16  ;;  %s70_s19 = int_to_ptr.hbm [resolvable:$true] %s69_s19 }
   0xf   :  { %50 = dma.hbm_to_vmem [thread:$0]  %s46_s12, 64, %s48_s16, [#allocation6]  }
  0x10   :  { %s1592_s0 = smov [#allocation10]  }
  0x11   :  { %s71_s20 = sshll.u32 %s1592_s0, 4  ;;  %s72_s20 = int_to_ptr.vmem [resolvable:$true] %s71_s20 }
  0x12   :  { %74 = dma.hbm_to_vmem [thread:$0]  %s70_s19, 32, %s72_s20, [#allocation9]  }
  0x13   :  { %1574 = dma.done.wait [#allocation3], 1536  }
  0x14   :  { %1575 = vsyncadd [#allocation3], 4294965760 }
  0x15   :  { %1576 = dma.done.wait [#allocation6], 49216  }
  0x16   :  { %1577 = vsyncadd [#allocation6], 4294918080 }
  0x17   :  { %1578 = dma.done.wait [#allocation9], 16416  }
  0x18   :  { %1579 = vsyncadd [#allocation9], 4294950880  ;;  %v167_v0 = vld [vmem:[#allocation5 + $0x1e0] sm:$0xff]  ;;  %s1593_s2 = smov [#allocation11]   ;;  %s1393_s23 = sshll.u32 %s1785_s5, 4  ;;  %s1394_s23 = int_to_ptr.hbm [resolvable:$true] %s1393_s23 }
  0x19   :  { %v231_v1 = vld [vmem:[#allocation5 + $0x3e0] sm:$0xff]  ;;  %501 = vmatpush.msra.mxu0 %v167_v0  ;;  %s1391_s4 = sshll.u32 %s1593_s2, 4  ;;  %s1392_s4 = int_to_ptr.vmem [resolvable:$true] %s1391_s4 }
  0x1a   :  { %v295_v2 = vld [vmem:[#allocation5 + $0x5e0] sm:$0xff]  ;;  %524 = vmatpush.msra.mxu1 %v231_v1  ;;  %v168_v1 = vld [vmem:[#allocation5 + $0x1e8] sm:$0xff] }
  0x1b   :  { %v163_v3 = vld [vmem:[#allocation5 + $0x1c0] sm:$0xff]  ;;  %547 = vmatpush.msra.mxu2 %v295_v2 }
  0x1c   :  { %v227_v4 = vld [vmem:[#allocation5 + $0x3c0] sm:$0xff]  ;;  %502 = vmatpush.msra.mxu0 %v163_v3 }
  0x1d   :  { %v291_v5 = vld [vmem:[#allocation5 + $0x5c0] sm:$0xff]  ;;  %525 = vmatpush.msra.mxu1 %v227_v4 }
  0x1e   :  { %v359_v6 = vld [vmem:[#allocation5 + $0x7e0] sm:$0xff]  ;;  %548 = vmatpush.msra.mxu2 %v291_v5  ;;  %v164_v5 = vld [vmem:[#allocation5 + $0x1c8] sm:$0xff] }
  0x1f   :  { %v159_v7 = vld [vmem:[#allocation5 + $0x1a0] sm:$0xff]  ;;  %570 = vmatpush.msra.mxu3 %v359_v6  ;;  %v232_v6 = vld [vmem:[#allocation5 + $0x3e8] sm:$0xff] }
  0x20   :  { %v223_v8 = vld [vmem:[#allocation5 + $0x3a0] sm:$0xff]  ;;  %503 = vmatpush.msra.mxu0 %v159_v7 }
  0x21   :  { %v287_v9 = vld [vmem:[#allocation5 + $0x5a0] sm:$0xff]  ;;  %526 = vmatpush.msra.mxu1 %v223_v8 }
  0x22   :  { %v355_v10 = vld [vmem:[#allocation5 + $0x7c0] sm:$0xff]  ;;  %549 = vmatpush.msra.mxu2 %v287_v9  ;;  %v160_v9 = vld [vmem:[#allocation5 + $0x1a8] sm:$0xff] }
  0x23   :  { %v155_v11 = vld [vmem:[#allocation5 + $0x180] sm:$0xff]  ;;  %571 = vmatpush.msra.mxu3 %v355_v10  ;;  %v228_v10 = vld [vmem:[#allocation5 + $0x3c8] sm:$0xff] }
  0x24   :  { %v219_v12 = vld [vmem:[#allocation5 + $0x380] sm:$0xff]  ;;  %504 = vmatpush.msra.mxu0 %v155_v11 }
  0x25   :  { %v283_v13 = vld [vmem:[#allocation5 + $0x580] sm:$0xff]  ;;  %527 = vmatpush.msra.mxu1 %v219_v12 }
  0x26   :  { %v351_v14 = vld [vmem:[#allocation5 + $0x7a0] sm:$0xff]  ;;  %550 = vmatpush.msra.mxu2 %v283_v13  ;;  %v156_v13 = vld [vmem:[#allocation5 + $0x188] sm:$0xff] }
  0x27   :  { %v151_v15 = vld [vmem:[#allocation5 + $0x160] sm:$0xff]  ;;  %572 = vmatpush.msra.mxu3 %v351_v14  ;;  %v224_v14 = vld [vmem:[#allocation5 + $0x3a8] sm:$0xff] }
  0x28   :  { %v215_v16 = vld [vmem:[#allocation5 + $0x360] sm:$0xff]  ;;  %505 = vmatpush.msra.mxu0 %v151_v15 }
  0x29   :  { %v279_v17 = vld [vmem:[#allocation5 + $0x560] sm:$0xff]  ;;  %528 = vmatpush.msra.mxu1 %v215_v16 }
  0x2a   :  { %v347_v18 = vld [vmem:[#allocation5 + $0x780] sm:$0xff]  ;;  %551 = vmatpush.msra.mxu2 %v279_v17  ;;  %v152_v17 = vld [vmem:[#allocation5 + $0x168] sm:$0xff] }
  0x2b   :  { %v147_v19 = vld [vmem:[#allocation5 + $0x140] sm:$0xff]  ;;  %573 = vmatpush.msra.mxu3 %v347_v18  ;;  %v220_v18 = vld [vmem:[#allocation5 + $0x388] sm:$0xff] }
  0x2c   :  { %v211_v20 = vld [vmem:[#allocation5 + $0x340] sm:$0xff]  ;;  %506 = vmatpush.msra.mxu0 %v147_v19 }
  0x2d   :  { %v275_v21 = vld [vmem:[#allocation5 + $0x540] sm:$0xff]  ;;  %529 = vmatpush.msra.mxu1 %v211_v20 }
  0x2e   :  { %v343_v22 = vld [vmem:[#allocation5 + $0x760] sm:$0xff]  ;;  %552 = vmatpush.msra.mxu2 %v275_v21  ;;  %v148_v21 = vld [vmem:[#allocation5 + $0x148] sm:$0xff] }
  0x2f   :  { %v143_v23 = vld [vmem:[#allocation5 + $0x120] sm:$0xff]  ;;  %574 = vmatpush.msra.mxu3 %v343_v22  ;;  %v216_v22 = vld [vmem:[#allocation5 + $0x368] sm:$0xff] }
  0x30   :  { %v207_v24 = vld [vmem:[#allocation5 + $0x320] sm:$0xff]  ;;  %507 = vmatpush.msra.mxu0 %v143_v23 }
  0x31   :  { %v271_v25 = vld [vmem:[#allocation5 + $0x520] sm:$0xff]  ;;  %530 = vmatpush.msra.mxu1 %v207_v24 }
  0x32   :  { %v339_v26 = vld [vmem:[#allocation5 + $0x740] sm:$0xff]  ;;  %553 = vmatpush.msra.mxu2 %v271_v25  ;;  %v144_v25 = vld [vmem:[#allocation5 + $0x128] sm:$0xff] }
  0x33   :  { %v139_v27 = vld [vmem:[#allocation5 + $0x100] sm:$0xff]  ;;  %575 = vmatpush.msra.mxu3 %v339_v26  ;;  %v212_v26 = vld [vmem:[#allocation5 + $0x348] sm:$0xff] }
  0x34   :  { %v203_v28 = vld [vmem:[#allocation5 + $0x300] sm:$0xff]  ;;  %508 = vmatpush.msra.mxu0 %v139_v27 }
  0x35   :  { %v267_v29 = vld [vmem:[#allocation5 + $0x500] sm:$0xff]  ;;  %531 = vmatpush.msra.mxu1 %v203_v28 }
  0x36   :  { %v335_v30 = vld [vmem:[#allocation5 + $0x720] sm:$0xff]  ;;  %554 = vmatpush.msra.mxu2 %v267_v29  ;;  %v140_v29 = vld [vmem:[#allocation5 + $0x108] sm:$0xff] }
  0x37   :  { %v135_v31 = vld [vmem:[#allocation5 + $0xe0] sm:$0xff]  ;;  %576 = vmatpush.msra.mxu3 %v335_v30  ;;  %v208_v30 = vld [vmem:[#allocation5 + $0x328] sm:$0xff] }
  0x38   :  { %v199_v32 = vld [vmem:[#allocation5 + $0x2e0] sm:$0xff]  ;;  %509 = vmatpush.msra.mxu0 %v135_v31 }
  0x39   :  { %v263_v33 = vld [vmem:[#allocation5 + $0x4e0] sm:$0xff]  ;;  %532 = vmatpush.msra.mxu1 %v199_v32 }
  0x3a   :  { %v331_v34 = vld [vmem:[#allocation5 + $0x700] sm:$0xff]  ;;  %555 = vmatpush.msra.mxu2 %v263_v33  ;;  %v136_v33 = vld [vmem:[#allocation5 + $0xe8] sm:$0xff] }
  0x3b   :  { %v131_v35 = vld [vmem:[#allocation5 + $0xc0] sm:$0xff]  ;;  %577 = vmatpush.msra.mxu3 %v331_v34  ;;  %v204_v34 = vld [vmem:[#allocation5 + $0x308] sm:$0xff] }
  0x3c   :  { %v195_v36 = vld [vmem:[#allocation5 + $0x2c0] sm:$0xff]  ;;  %510 = vmatpush.msra.mxu0 %v131_v35 }
  0x3d   :  { %v259_v37 = vld [vmem:[#allocation5 + $0x4c0] sm:$0xff]  ;;  %533 = vmatpush.msra.mxu1 %v195_v36 }
  0x3e   :  { %v327_v38 = vld [vmem:[#allocation5 + $0x6e0] sm:$0xff]  ;;  %556 = vmatpush.msra.mxu2 %v259_v37  ;;  %v132_v37 = vld [vmem:[#allocation5 + $0xc8] sm:$0xff] }
  0x3f   :  { %v127_v39 = vld [vmem:[#allocation5 + $0xa0] sm:$0xff]  ;;  %578 = vmatpush.msra.mxu3 %v327_v38  ;;  %v200_v38 = vld [vmem:[#allocation5 + $0x2e8] sm:$0xff] }
  0x40   :  { %v191_v40 = vld [vmem:[#allocation5 + $0x2a0] sm:$0xff]  ;;  %511 = vmatpush.msra.mxu0 %v127_v39 }
  0x41   :  { %v255_v41 = vld [vmem:[#allocation5 + $0x4a0] sm:$0xff]  ;;  %534 = vmatpush.msra.mxu1 %v191_v40 }
  0x42   :  { %v323_v42 = vld [vmem:[#allocation5 + $0x6c0] sm:$0xff]  ;;  %557 = vmatpush.msra.mxu2 %v255_v41  ;;  %v128_v41 = vld [vmem:[#allocation5 + $0xa8] sm:$0xff] }
  0x43   :  { %v123_v43 = vld [vmem:[#allocation5 + $0x80] sm:$0xff]  ;;  %579 = vmatpush.msra.mxu3 %v323_v42  ;;  %v196_v42 = vld [vmem:[#allocation5 + $0x2c8] sm:$0xff] }
  0x44   :  { %v187_v44 = vld [vmem:[#allocation5 + $0x280] sm:$0xff]  ;;  %512 = vmatpush.msra.mxu0 %v123_v43 }
  0x45   :  { %v251_v45 = vld [vmem:[#allocation5 + $0x480] sm:$0xff]  ;;  %535 = vmatpush.msra.mxu1 %v187_v44 }
  0x46   :  { %v319_v46 = vld [vmem:[#allocation5 + $0x6a0] sm:$0xff]  ;;  %558 = vmatpush.msra.mxu2 %v251_v45  ;;  %v124_v45 = vld [vmem:[#allocation5 + $0x88] sm:$0xff] }
  0x47   :  { %v119_v47 = vld [vmem:[#allocation5 + $0x60] sm:$0xff]  ;;  %580 = vmatpush.msra.mxu3 %v319_v46  ;;  %v192_v46 = vld [vmem:[#allocation5 + $0x2a8] sm:$0xff] }
  0x48   :  { %v183_v48 = vld [vmem:[#allocation5 + $0x260] sm:$0xff]  ;;  %513 = vmatpush.msra.mxu0 %v119_v47 }
  0x49   :  { %v247_v49 = vld [vmem:[#allocation5 + $0x460] sm:$0xff]  ;;  %536 = vmatpush.msra.mxu1 %v183_v48 }
  0x4a   :  { %v315_v50 = vld [vmem:[#allocation5 + $0x680] sm:$0xff]  ;;  %559 = vmatpush.msra.mxu2 %v247_v49  ;;  %v120_v49 = vld [vmem:[#allocation5 + $0x68] sm:$0xff] }
  0x4b   :  { %v115_v51 = vld [vmem:[#allocation5 + $0x40] sm:$0xff]  ;;  %581 = vmatpush.msra.mxu3 %v315_v50  ;;  %v188_v50 = vld [vmem:[#allocation5 + $0x288] sm:$0xff] }
  0x4c   :  { %v179_v52 = vld [vmem:[#allocation5 + $0x240] sm:$0xff]  ;;  %514 = vmatpush.msra.mxu0 %v115_v51 }
  0x4d   :  { %v243_v53 = vld [vmem:[#allocation5 + $0x440] sm:$0xff]  ;;  %537 = vmatpush.msra.mxu1 %v179_v52 }
  0x4e   :  { %v311_v54 = vld [vmem:[#allocation5 + $0x660] sm:$0xff]  ;;  %560 = vmatpush.msra.mxu2 %v243_v53 }
  0x4f   :  { %v111_v55 = vld [vmem:[#allocation5 + $0x20] sm:$0xff]  ;;  %582 = vmatpush.msra.mxu3 %v311_v54  ;;  %v116_v54 = vld [vmem:[#allocation5 + $0x48] sm:$0xff] }
  0x50   :  { %v175_v56 = vld [vmem:[#allocation5 + $0x220] sm:$0xff]  ;;  %515 = vmatpush.msra.mxu0 %v111_v55  ;;  %v184_v55 = vld [vmem:[#allocation5 + $0x268] sm:$0xff] }
  0x51   :  { %v239_v57 = vld [vmem:[#allocation5 + $0x420] sm:$0xff]  ;;  %538 = vmatpush.msra.mxu1 %v175_v56  ;;  %v1644_v56 = vld [vmem:[#allocation2 + $0x8] sm:$0xff] }
  0x52   :  { %v307_v58 = vld [vmem:[#allocation5 + $0x640] sm:$0xff]  ;;  %561 = vmatpush.msra.mxu2 %v239_v57 }
  0x53   :  { %v107_v59 = vld [vmem:[#allocation5] sm:$0xff]  ;;  %583 = vmatpush.msra.mxu3 %v307_v58 }
  0x54   :  { %v171_v60 = vld [vmem:[#allocation5 + $0x200] sm:$0xff]  ;;  %516 = vmatpush.msra.mxu0 %v107_v59  ;;  %v112_v59 = vld [vmem:[#allocation5 + $0x28] sm:$0xff] }
  0x55   :  { %v235_v61 = vld [vmem:[#allocation5 + $0x400] sm:$0xff]  ;;  %539 = vmatpush.msra.mxu1 %v171_v60  ;;  %v180_v60 = vld [vmem:[#allocation5 + $0x248] sm:$0xff] }
  0x56   :  { %v303_v62 = vld [vmem:[#allocation5 + $0x620] sm:$0xff]  ;;  %562 = vmatpush.msra.mxu2 %v235_v61  ;;  %540 = vmatmul.f32.vlgmr.msra.gmra.mxu1 %v1644_v56  ;;  %v1648_v61 = vld [vmem:[#allocation2 + $0x10] sm:$0xff] }
  0x57   :  { %v423_v63 = vld [vmem:[#allocation5 + $0x9e0] sm:$0xff]  ;;  %584 = vmatpush.msra.mxu3 %v303_v62  ;;  %563 = vmatmul.f32.vlgmr.msra.gmra.mxu2 %v1648_v61 }
  0x58   :  { %v487_v0 = vld [vmem:[#allocation5 + $0xbe0] sm:$0xff]  ;;  %593 = vmatpush.msrb.mxu0 %v423_v63  ;;  %639 = vmatpush.msrb.mxu2 %v168_v1  ;;  %v176_v1 = vld [vmem:[#allocation5 + $0x228] sm:$0xff] }
  0x59   :  { %v299_v2 = vld [vmem:[#allocation5 + $0x600] sm:$0xff]  ;;  %616 = vmatpush.msrb.mxu1 %v487_v0  ;;  %v108_v0 = vld [vmem:[#allocation5 + $0x8] sm:$0xff] }
  0x5a   :  { %v419_v3 = vld [vmem:[#allocation5 + $0x9c0] sm:$0xff]  ;;  %585 = vmatpush.msra.mxu3 %v299_v2  ;;  %640 = vmatpush.msrb.mxu2 %v164_v5  ;;  %v296_v2 = vld [vmem:[#allocation5 + $0x5e8] sm:$0xff]  ;;  %v1651_v5 = vld [vmem:[#allocation2 + $0x18] sm:$0xff] }
  0x5b   :  { %v483_v4 = vld [vmem:[#allocation5 + $0xbc0] sm:$0xff]  ;;  %594 = vmatpush.msrb.mxu0 %v419_v3  ;;  %v360_v3 = vld [vmem:[#allocation5 + $0x7e8] sm:$0xff]  ;;  %586 = vmatmul.f32.vlgmr.msra.gmra.mxu3 %v1651_v5 }
  0x5c   :  { %v415_v7 = vld [vmem:[#allocation5 + $0x9a0] sm:$0xff]  ;;  %617 = vmatpush.msrb.mxu1 %v483_v4  ;;  %662 = vmatpush.msrb.mxu3 %v232_v6  ;;  %v424_v4 = vld [vmem:[#allocation5 + $0x9e8] sm:$0xff]  ;;  %v1653_v6 = vld [vmem:[#allocation2 + $0x30] sm:$0xff] }
  0x5d   :  { %v479_v8 = vld [vmem:[#allocation5 + $0xba0] sm:$0xff]  ;;  %595 = vmatpush.msrb.mxu0 %v415_v7  ;;  %641 = vmatpush.msrb.mxu2 %v160_v9  ;;  %v172_v7 = vld [vmem:[#allocation5 + $0x208] sm:$0xff] }
  0x5e   :  { %v411_v11 = vld [vmem:[#allocation5 + $0x980] sm:$0xff]  ;;  %618 = vmatpush.msrb.mxu1 %v479_v8  ;;  %663 = vmatpush.msrb.mxu3 %v228_v10  ;;  %v292_v8 = vld [vmem:[#allocation5 + $0x5c8] sm:$0xff] }
  0x5f   :  { %v475_v12 = vld [vmem:[#allocation5 + $0xb80] sm:$0xff]  ;;  %596 = vmatpush.msrb.mxu0 %v411_v11  ;;  %642 = vmatpush.msrb.mxu2 %v156_v13  ;;  %v356_v9 = vld [vmem:[#allocation5 + $0x7c8] sm:$0xff] }
  0x60   :  { %v407_v15 = vld [vmem:[#allocation5 + $0x960] sm:$0xff]  ;;  %619 = vmatpush.msrb.mxu1 %v475_v12  ;;  %664 = vmatpush.msrb.mxu3 %v224_v14  ;;  %v420_v10 = vld [vmem:[#allocation5 + $0x9c8] sm:$0xff]  ;;  %v1657_v12 = vld [vmem:[#allocation2 + $0x38] sm:$0xff] }
  0x61   :  { %v471_v16 = vld [vmem:[#allocation5 + $0xb60] sm:$0xff]  ;;  %597 = vmatpush.msrb.mxu0 %v407_v15  ;;  %643 = vmatpush.msrb.mxu2 %v152_v17  ;;  %v488_v11 = vld [vmem:[#allocation5 + $0xbe8] sm:$0xff] }
  0x62   :  { %v403_v19 = vld [vmem:[#allocation5 + $0x940] sm:$0xff]  ;;  %620 = vmatpush.msrb.mxu1 %v471_v16  ;;  %665 = vmatpush.msrb.mxu3 %v220_v18  ;;  %v288_v13 = vld [vmem:[#allocation5 + $0x5a8] sm:$0xff] }
  0x63   :  { %v467_v20 = vld [vmem:[#allocation5 + $0xb40] sm:$0xff]  ;;  %598 = vmatpush.msrb.mxu0 %v403_v19  ;;  %644 = vmatpush.msrb.mxu2 %v148_v21  ;;  %v352_v14 = vld [vmem:[#allocation5 + $0x7a8] sm:$0xff] }
  0x64   :  { %v399_v23 = vld [vmem:[#allocation5 + $0x920] sm:$0xff]  ;;  %621 = vmatpush.msrb.mxu1 %v467_v20  ;;  %666 = vmatpush.msrb.mxu3 %v216_v22  ;;  %v416_v15 = vld [vmem:[#allocation5 + $0x9a8] sm:$0xff] }
  0x65   :  { %v463_v24 = vld [vmem:[#allocation5 + $0xb20] sm:$0xff]  ;;  %599 = vmatpush.msrb.mxu0 %v399_v23  ;;  %645 = vmatpush.msrb.mxu2 %v144_v25  ;;  %v484_v16 = vld [vmem:[#allocation5 + $0xbc8] sm:$0xff] }
  0x66   :  { %v395_v27 = vld [vmem:[#allocation5 + $0x900] sm:$0xff]  ;;  %622 = vmatpush.msrb.mxu1 %v463_v24  ;;  %667 = vmatpush.msrb.mxu3 %v212_v26  ;;  %v284_v17 = vld [vmem:[#allocation5 + $0x588] sm:$0xff] }
  0x67   :  { %v459_v28 = vld [vmem:[#allocation5 + $0xb00] sm:$0xff]  ;;  %600 = vmatpush.msrb.mxu0 %v395_v27  ;;  %646 = vmatpush.msrb.mxu2 %v140_v29  ;;  %v348_v18 = vld [vmem:[#allocation5 + $0x788] sm:$0xff] }
  0x68   :  { %v391_v31 = vld [vmem:[#allocation5 + $0x8e0] sm:$0xff]  ;;  %623 = vmatpush.msrb.mxu1 %v459_v28  ;;  %668 = vmatpush.msrb.mxu3 %v208_v30  ;;  %v412_v19 = vld [vmem:[#allocation5 + $0x988] sm:$0xff] }
  0x69   :  { %v455_v32 = vld [vmem:[#allocation5 + $0xae0] sm:$0xff]  ;;  %601 = vmatpush.msrb.mxu0 %v391_v31  ;;  %647 = vmatpush.msrb.mxu2 %v136_v33  ;;  %v480_v20 = vld [vmem:[#allocation5 + $0xba8] sm:$0xff] }
  0x6a   :  { %v387_v35 = vld [vmem:[#allocation5 + $0x8c0] sm:$0xff]  ;;  %624 = vmatpush.msrb.mxu1 %v455_v32  ;;  %669 = vmatpush.msrb.mxu3 %v204_v34  ;;  %v280_v22 = vld [vmem:[#allocation5 + $0x568] sm:$0xff] }
  0x6b   :  { %v451_v36 = vld [vmem:[#allocation5 + $0xac0] sm:$0xff]  ;;  %602 = vmatpush.msrb.mxu0 %v387_v35  ;;  %648 = vmatpush.msrb.mxu2 %v132_v37  ;;  %v344_v23 = vld [vmem:[#allocation5 + $0x768] sm:$0xff] }
  0x6c   :  { %v383_v39 = vld [vmem:[#allocation5 + $0x8a0] sm:$0xff]  ;;  %625 = vmatpush.msrb.mxu1 %v451_v36  ;;  %670 = vmatpush.msrb.mxu3 %v200_v38  ;;  %v408_v24 = vld [vmem:[#allocation5 + $0x968] sm:$0xff] }
  0x6d   :  { %v447_v40 = vld [vmem:[#allocation5 + $0xaa0] sm:$0xff]  ;;  %603 = vmatpush.msrb.mxu0 %v383_v39  ;;  %649 = vmatpush.msrb.mxu2 %v128_v41  ;;  %v476_v25 = vld [vmem:[#allocation5 + $0xb88] sm:$0xff] }
  0x6e   :  { %v379_v43 = vld [vmem:[#allocation5 + $0x880] sm:$0xff]  ;;  %626 = vmatpush.msrb.mxu1 %v447_v40  ;;  %671 = vmatpush.msrb.mxu3 %v196_v42  ;;  %v1665_v27 = vld [vmem:[#allocation2 + $0x48] sm:$0xff] }
  0x6f   :  { %v443_v44 = vld [vmem:[#allocation5 + $0xa80] sm:$0xff]  ;;  %604 = vmatpush.msrb.mxu0 %v379_v43  ;;  %650 = vmatpush.msrb.mxu2 %v124_v45  ;;  %v276_v28 = vld [vmem:[#allocation5 + $0x548] sm:$0xff] }
  0x70   :  { %v375_v47 = vld [vmem:[#allocation5 + $0x860] sm:$0xff]  ;;  %627 = vmatpush.msrb.mxu1 %v443_v44  ;;  %672 = vmatpush.msrb.mxu3 %v192_v46  ;;  %v340_v29 = vld [vmem:[#allocation5 + $0x748] sm:$0xff] }
  0x71   :  { %v439_v48 = vld [vmem:[#allocation5 + $0xa60] sm:$0xff]  ;;  %605 = vmatpush.msrb.mxu0 %v375_v47  ;;  %651 = vmatpush.msrb.mxu2 %v120_v49  ;;  %v404_v30 = vld [vmem:[#allocation5 + $0x948] sm:$0xff] }
  0x72   :  { %v1642_v51 = vld [vmem:[#allocation2] sm:$0xff]  ;;  %628 = vmatpush.msrb.mxu1 %v439_v48  ;;  %673 = vmatpush.msrb.mxu3 %v188_v50  ;;  %v472_v31 = vld [vmem:[#allocation5 + $0xb68] sm:$0xff] }
  0x73   :  { %v435_v52 = vld [vmem:[#allocation5 + $0xa40] sm:$0xff]  ;;  %517 = vmatmul.f32.vlgmr.msra.gmra.mxu0 %v1642_v51  ;;  %652 = vmatpush.msrb.mxu2 %v116_v54  ;;  %v1668_v32 = vld [vmem:[#allocation2 + $0x28] sm:$0xff] }
  0x74   :  { %v371_v53 = vld [vmem:[#allocation5 + $0x840] sm:$0xff]  ;;  %629 = vmatpush.msrb.mxu1 %v435_v52  ;;  %674 = vmatpush.msrb.mxu3 %v184_v55  ;;  %v272_v33 = vld [vmem:[#allocation5 + $0x528] sm:$0xff] }
  0x75   :  { %v367_v57 = vld [vmem:[#allocation5 + $0x820] sm:$0xff]  ;;  %606 = vmatpush.msrb.mxu0 %v371_v53  ;;  %653 = vmatpush.msrb.mxu2 %v112_v59  ;;  %v336_v34 = vld [vmem:[#allocation5 + $0x728] sm:$0xff] }
  0x76   :  { %v431_v58 = vld [vmem:[#allocation5 + $0xa20] sm:$0xff]  ;;  %675 = vmatpush.msrb.mxu3 %v180_v60  ;;  %543 = vmatmul.f32.gmra.mxu1 %v1657_v12  ;;  %v400_v35 = vld [vmem:[#allocation5 + $0x928] sm:$0xff] }
  0x77   :  { %v363_v62 = vld [vmem:[#allocation5 + $0x800] sm:$0xff]  ;;  %607 = vmatpush.msrb.mxu0 %v367_v57  ;;  %630 = vmatpush.msrb.mxu1 %v431_v58  ;;  %v468_v36 = vld [vmem:[#allocation5 + $0xb48] sm:$0xff] }
  0x78   :  { %v427_v63 = vld [vmem:[#allocation5 + $0xa00] sm:$0xff]  ;;  %654 = vmatpush.msrb.mxu2 %v108_v0  ;;  %676 = vmatpush.msrb.mxu3 %v176_v1  ;;  %v268_v37 = vld [vmem:[#allocation5 + $0x508] sm:$0xff]  ;;  %v1674_v0 = vld [vmem:[#allocation2 + $0x50] sm:$0xff] }
  0x79   :  { %608 = vmatpush.msrb.mxu0 %v363_v62  ;;  %631 = vmatpush.msrb.mxu1 %v427_v63  ;;  %v1660_v21 = vld [vmem:[#allocation2 + $0x40] sm:$0xff]  ;;  %v332_v38 = vld [vmem:[#allocation5 + $0x708] sm:$0xff] }
  0x7a   :  { %731 = vmatpush.msra.mxu2 %v424_v4  ;;  %677 = vmatpush.msrb.mxu3 %v172_v7  ;;  %v1662_v26 = vld [vmem:[#allocation2 + $0x20] sm:$0xff]  ;;  %v396_v39 = vld [vmem:[#allocation5 + $0x908] sm:$0xff]  ;;  %v1678_v7 = vld [vmem:[#allocation2 + $0x58] sm:$0xff] }
  0x7b   :  { %685 = vmatpush.msra.mxu0 %v296_v2  ;;  %708 = vmatpush.msra.mxu1 %v360_v3  ;;  %v464_v40 = vld [vmem:[#allocation5 + $0xb28] sm:$0xff] }
  0x7c   :  { %520 = vmatmul.f32.gmra.mxu0 %v1653_v6  ;;  %732 = vmatpush.msra.mxu2 %v420_v10  ;;  %v264_v41 = vld [vmem:[#allocation5 + $0x4e8] sm:$0xff] }
  0x7d   :  { %686 = vmatpush.msra.mxu0 %v292_v8  ;;  %709 = vmatpush.msra.mxu1 %v356_v9  ;;  %v328_v42 = vld [vmem:[#allocation5 + $0x6e8] sm:$0xff] }
  0x7e   :  { %754 = vmatpush.msra.mxu3 %v488_v11  ;;  %733 = vmatpush.msra.mxu2 %v416_v15  ;;  %v392_v43 = vld [vmem:[#allocation5 + $0x8e8] sm:$0xff] }
  0x7f   :  { %687 = vmatpush.msra.mxu0 %v288_v13  ;;  %710 = vmatpush.msra.mxu1 %v352_v14  ;;  %v460_v44 = vld [vmem:[#allocation5 + $0xb08] sm:$0xff] }
  0x80   :  { %755 = vmatpush.msra.mxu3 %v484_v16  ;;  %734 = vmatpush.msra.mxu2 %v412_v19  ;;  %v260_v45 = vld [vmem:[#allocation5 + $0x4c8] sm:$0xff]  ;;  %v297_v19 = vld [vmem:[#allocation5 + $0x5f0] sm:$0xff] }
  0x81   :  { %688 = vmatpush.msra.mxu0 %v284_v17  ;;  %711 = vmatpush.msra.mxu1 %v348_v18  ;;  %v324_v46 = vld [vmem:[#allocation5 + $0x6c8] sm:$0xff]  ;;  %v169_v17 = vld [vmem:[#allocation5 + $0x1f0] sm:$0xff] }
  0x82   :  { %756 = vmatpush.msra.mxu3 %v480_v20  ;;  %566 = vmatmul.f32.gmra.mxu2 %v1660_v21  ;;  %v388_v47 = vld [vmem:[#allocation5 + $0x8c8] sm:$0xff]  ;;  %v233_v18 = vld [vmem:[#allocation5 + $0x3f0] sm:$0xff] }
  0x83   :  { %689 = vmatpush.msra.mxu0 %v280_v22  ;;  %712 = vmatpush.msra.mxu1 %v344_v23  ;;  %v456_v48 = vld [vmem:[#allocation5 + $0xae8] sm:$0xff]  ;;  %v165_v22 = vld [vmem:[#allocation5 + $0x1d0] sm:$0xff] }
  0x84   :  { %735 = vmatpush.msra.mxu2 %v408_v24  ;;  %757 = vmatpush.msra.mxu3 %v476_v25  ;;  %v256_v49 = vld [vmem:[#allocation5 + $0x4a8] sm:$0xff]  ;;  %v229_v23 = vld [vmem:[#allocation5 + $0x3d0] sm:$0xff] }
  0x85   :  { %609 = vmatmul.f32.vlgmr.msrb.gmra.mxu0 %v1662_v26  ;;  %589 = vmatmul.f32.gmra.mxu3 %v1665_v27  ;;  %v320_v50 = vld [vmem:[#allocation5 + $0x6a8] sm:$0xff]  ;;  %v293_v24 = vld [vmem:[#allocation5 + $0x5d0] sm:$0xff] }
  0x86   :  { %690 = vmatpush.msra.mxu0 %v276_v28  ;;  %713 = vmatpush.msra.mxu1 %v340_v29  ;;  %v384_v52 = vld [vmem:[#allocation5 + $0x8a8] sm:$0xff]  ;;  %v361_v25 = vld [vmem:[#allocation5 + $0x7f0] sm:$0xff] }
  0x87   :  { %736 = vmatpush.msra.mxu2 %v404_v30  ;;  %758 = vmatpush.msra.mxu3 %v472_v31  ;;  %v452_v53 = vld [vmem:[#allocation5 + $0xac8] sm:$0xff]  ;;  %v161_v28 = vld [vmem:[#allocation5 + $0x1b0] sm:$0xff] }
  0x88   :  { %632 = vmatmul.f32.vlgmr.msrb.gmra.mxu1 %v1668_v32  ;;  %691 = vmatpush.msra.mxu0 %v272_v33  ;;  %v252_v54 = vld [vmem:[#allocation5 + $0x488] sm:$0xff]  ;;  %v225_v29 = vld [vmem:[#allocation5 + $0x3b0] sm:$0xff] }
  0x89   :  { %714 = vmatpush.msra.mxu1 %v336_v34  ;;  %737 = vmatpush.msra.mxu2 %v400_v35  ;;  %v316_v55 = vld [vmem:[#allocation5 + $0x688] sm:$0xff]  ;;  %v289_v30 = vld [vmem:[#allocation5 + $0x5b0] sm:$0xff] }
  0x8a   :  { %759 = vmatpush.msra.mxu3 %v468_v36  ;;  %692 = vmatpush.msra.mxu0 %v268_v37  ;;  %v380_v57 = vld [vmem:[#allocation5 + $0x888] sm:$0xff]  ;;  %v357_v31 = vld [vmem:[#allocation5 + $0x7d0] sm:$0xff] }
  0x8b   :  { %715 = vmatpush.msra.mxu1 %v332_v38  ;;  %738 = vmatpush.msra.mxu2 %v396_v39  ;;  %v448_v58 = vld [vmem:[#allocation5 + $0xaa8] sm:$0xff]  ;;  %v157_v33 = vld [vmem:[#allocation5 + $0x190] sm:$0xff] }
  0x8c   :  { %760 = vmatpush.msra.mxu3 %v464_v40  ;;  %655 = vmatmul.f32.vlgmr.msrb.gmra.mxu2 %v1642_v51  ;;  %v248_v59 = vld [vmem:[#allocation5 + $0x468] sm:$0xff]  ;;  %v221_v34 = vld [vmem:[#allocation5 + $0x390] sm:$0xff] }
  0x8d   :  { %693 = vmatpush.msra.mxu0 %v264_v41  ;;  %716 = vmatpush.msra.mxu1 %v328_v42  ;;  %v312_v60 = vld [vmem:[#allocation5 + $0x668] sm:$0xff]  ;;  %v285_v35 = vld [vmem:[#allocation5 + $0x590] sm:$0xff] }
  0x8e   :  { %739 = vmatpush.msra.mxu2 %v392_v43  ;;  %761 = vmatpush.msra.mxu3 %v460_v44  ;;  %v376_v62 = vld [vmem:[#allocation5 + $0x868] sm:$0xff]  ;;  %v353_v36 = vld [vmem:[#allocation5 + $0x7b0] sm:$0xff] }
  0x8f   :  { %694 = vmatpush.msra.mxu0 %v260_v45  ;;  %678 = vmatmul.f32.vlgmr.msrb.gmra.mxu3 %v1644_v56  ;;  %v444_v63 = vld [vmem:[#allocation5 + $0xa88] sm:$0xff]  ;;  %v153_v37 = vld [vmem:[#allocation5 + $0x170] sm:$0xff] }
  0x90   :  { %717 = vmatpush.msra.mxu1 %v324_v46  ;;  %740 = vmatpush.msra.mxu2 %v388_v47  ;;  %v244_v1 = vld [vmem:[#allocation5 + $0x448] sm:$0xff]  ;;  %v217_v38 = vld [vmem:[#allocation5 + $0x370] sm:$0xff] }
  0x91   :  { %762 = vmatpush.msra.mxu3 %v456_v48  ;;  %695 = vmatpush.msra.mxu0 %v256_v49  ;;  %v308_v2 = vld [vmem:[#allocation5 + $0x648] sm:$0xff]  ;;  %v281_v39 = vld [vmem:[#allocation5 + $0x570] sm:$0xff] }
  0x92   :  { %718 = vmatpush.msra.mxu1 %v320_v50  ;;  %741 = vmatpush.msra.mxu2 %v384_v52  ;;  %v372_v3 = vld [vmem:[#allocation5 + $0x848] sm:$0xff]  ;;  %v349_v40 = vld [vmem:[#allocation5 + $0x790] sm:$0xff] }
  0x93   :  { %763 = vmatpush.msra.mxu3 %v452_v53  ;;  %696 = vmatpush.msra.mxu0 %v252_v54  ;;  %v440_v4 = vld [vmem:[#allocation5 + $0xa68] sm:$0xff]  ;;  %v149_v41 = vld [vmem:[#allocation5 + $0x150] sm:$0xff] }
  0x94   :  { %719 = vmatpush.msra.mxu1 %v316_v55  ;;  %742 = vmatpush.msra.mxu2 %v380_v57  ;;  %v240_v8 = vld [vmem:[#allocation5 + $0x428] sm:$0xff]  ;;  %v213_v42 = vld [vmem:[#allocation5 + $0x350] sm:$0xff] }
  0x95   :  { %764 = vmatpush.msra.mxu3 %v448_v58  ;;  %658 = vmatmul.f32.gmra.mxu2 %v1653_v6  ;;  %v304_v9 = vld [vmem:[#allocation5 + $0x628] sm:$0xff]  ;;  %v277_v43 = vld [vmem:[#allocation5 + $0x550] sm:$0xff] }
  0x96   :  { %697 = vmatpush.msra.mxu0 %v248_v59  ;;  %720 = vmatpush.msra.mxu1 %v312_v60  ;;  %v368_v10 = vld [vmem:[#allocation5 + $0x828] sm:$0xff]  ;;  %v345_v44 = vld [vmem:[#allocation5 + $0x770] sm:$0xff] }
  0x97   :  { %743 = vmatpush.msra.mxu2 %v376_v62  ;;  %765 = vmatpush.msra.mxu3 %v444_v63  ;;  %v436_v11 = vld [vmem:[#allocation5 + $0xa48] sm:$0xff]  ;;  %v145_v45 = vld [vmem:[#allocation5 + $0x130] sm:$0xff] }
  0x98   :  { %612 = vmatmul.f32.gmra.mxu0 %v1674_v0  ;;  %681 = vmatmul.f32.gmra.mxu3 %v1657_v12  ;;  %v236_v13 = vld [vmem:[#allocation5 + $0x408] sm:$0xff]  ;;  %v209_v46 = vld [vmem:[#allocation5 + $0x330] sm:$0xff] }
  0x99   :  { %698 = vmatpush.msra.mxu0 %v244_v1  ;;  %721 = vmatpush.msra.mxu1 %v308_v2  ;;  %v300_v14 = vld [vmem:[#allocation5 + $0x608] sm:$0xff]  ;;  %v273_v47 = vld [vmem:[#allocation5 + $0x530] sm:$0xff] }
  0x9a   :  { %744 = vmatpush.msra.mxu2 %v372_v3  ;;  %766 = vmatpush.msra.mxu3 %v440_v4  ;;  %v364_v15 = vld [vmem:[#allocation5 + $0x808] sm:$0xff]  ;;  %v341_v48 = vld [vmem:[#allocation5 + $0x750] sm:$0xff] }
  0x9b   :  { %635 = vmatmul.f32.gmra.mxu1 %v1678_v7  ;;  %699 = vmatpush.msra.mxu0 %v240_v8  ;;  %v432_v16 = vld [vmem:[#allocation5 + $0xa28] sm:$0xff]  ;;  %v141_v49 = vld [vmem:[#allocation5 + $0x110] sm:$0xff] }
  0x9c   :  { %722 = vmatpush.msra.mxu1 %v304_v9  ;;  %745 = vmatpush.msra.mxu2 %v368_v10  ;;  %v428_v20 = vld [vmem:[#allocation5 + $0xa08] sm:$0xff]  ;;  %v205_v50 = vld [vmem:[#allocation5 + $0x310] sm:$0xff] }
  0x9d   :  { %767 = vmatpush.msra.mxu3 %v436_v11  ;;  %700 = vmatpush.msra.mxu0 %v236_v13  ;;  %v269_v52 = vld [vmem:[#allocation5 + $0x510] sm:$0xff] }
  0x9e   :  { %723 = vmatpush.msra.mxu1 %v300_v14  ;;  %746 = vmatpush.msra.mxu2 %v364_v15  ;;  %v337_v53 = vld [vmem:[#allocation5 + $0x730] sm:$0xff] }
  0x9f   :  { %768 = vmatpush.msra.mxu3 %v432_v16  ;;  %747 = vmatmul.f32.vlgmr.msra.gmra.mxu2 %v1662_v26  ;;  %v137_v54 = vld [vmem:[#allocation5 + $0xf0] sm:$0xff] }
  0xa0   :  { %777 = vmatpush.msrb.mxu0 %v169_v17  ;;  %800 = vmatpush.msrb.mxu1 %v233_v18  ;;  %v201_v55 = vld [vmem:[#allocation5 + $0x2f0] sm:$0xff] }
  0xa1   :  { %823 = vmatpush.msrb.mxu2 %v297_v19  ;;  %769 = vmatpush.msra.mxu3 %v428_v20  ;;  %v265_v57 = vld [vmem:[#allocation5 + $0x4f0] sm:$0xff] }
  0xa2   :  { %701 = vmatmul.f32.vlgmr.msra.gmra.mxu0 %v1648_v61  ;;  %770 = vmatmul.f32.vlgmr.msra.gmra.mxu3 %v1668_v32  ;;  %v333_v58 = vld [vmem:[#allocation5 + $0x710] sm:$0xff] }
  0xa3   :  { %778 = vmatpush.msrb.mxu0 %v165_v22  ;;  %801 = vmatpush.msrb.mxu1 %v229_v23  ;;  %v133_v59 = vld [vmem:[#allocation5 + $0xd0] sm:$0xff] }
  0xa4   :  { %824 = vmatpush.msrb.mxu2 %v293_v24  ;;  %846 = vmatpush.msrb.mxu3 %v361_v25  ;;  %v197_v60 = vld [vmem:[#allocation5 + $0x2d0] sm:$0xff] }
  0xa5   :  { %724 = vmatmul.f32.vlgmr.msra.gmra.mxu1 %v1651_v5  ;;  %779 = vmatpush.msrb.mxu0 %v161_v28  ;;  %v261_v62 = vld [vmem:[#allocation5 + $0x4d0] sm:$0xff] }
  0xa6   :  { %802 = vmatpush.msrb.mxu1 %v225_v29  ;;  %825 = vmatpush.msrb.mxu2 %v289_v30  ;;  %v329_v63 = vld [vmem:[#allocation5 + $0x6f0] sm:$0xff] }
  0xa7   :  { %847 = vmatpush.msrb.mxu3 %v357_v31  ;;  %780 = vmatpush.msrb.mxu0 %v157_v33  ;;  %v129_v1 = vld [vmem:[#allocation5 + $0xb0] sm:$0xff] }
  0xa8   :  { %803 = vmatpush.msrb.mxu1 %v221_v34  ;;  %826 = vmatpush.msrb.mxu2 %v285_v35  ;;  %v193_v2 = vld [vmem:[#allocation5 + $0x2b0] sm:$0xff]  ;;  %v170_v35 = vld [vmem:[#allocation5 + $0x1f8] sm:$0xff] }
  0xa9   :  { %848 = vmatpush.msrb.mxu3 %v353_v36  ;;  %750 = vmatmul.f32.gmra.mxu2 %v1674_v0  ;;  %v257_v3 = vld [vmem:[#allocation5 + $0x4b0] sm:$0xff] }
  0xaa   :  { %781 = vmatpush.msrb.mxu0 %v153_v37  ;;  %804 = vmatpush.msrb.mxu1 %v217_v38  ;;  %v325_v4 = vld [vmem:[#allocation5 + $0x6d0] sm:$0xff] }
  0xab   :  { %827 = vmatpush.msrb.mxu2 %v281_v39  ;;  %849 = vmatpush.msrb.mxu3 %v349_v40  ;;  %v125_v8 = vld [vmem:[#allocation5 + $0x90] sm:$0xff]  ;;  %v166_v39 = vld [vmem:[#allocation5 + $0x1d8] sm:$0xff] }
  0xac   :  { %704 = vmatmul.f32.gmra.mxu0 %v1660_v21  ;;  %773 = vmatmul.f32.gmra.mxu3 %v1678_v7  ;;  %v189_v9 = vld [vmem:[#allocation5 + $0x290] sm:$0xff]  ;;  %v234_v40 = vld [vmem:[#allocation5 + $0x3f8] sm:$0xff] }
  0xad   :  { %782 = vmatpush.msrb.mxu0 %v149_v41  ;;  %805 = vmatpush.msrb.mxu1 %v213_v42  ;;  %v253_v10 = vld [vmem:[#allocation5 + $0x490] sm:$0xff] }
  0xae   :  { %828 = vmatpush.msrb.mxu2 %v277_v43  ;;  %850 = vmatpush.msrb.mxu3 %v345_v44  ;;  %v321_v11 = vld [vmem:[#allocation5 + $0x6b0] sm:$0xff]  ;;  %v162_v43 = vld [vmem:[#allocation5 + $0x1b8] sm:$0xff] }
  0xaf   :  { %727 = vmatmul.f32.gmra.mxu1 %v1665_v27  ;;  %783 = vmatpush.msrb.mxu0 %v145_v45  ;;  %v121_v13 = vld [vmem:[#allocation5 + $0x70] sm:$0xff]  ;;  %v230_v44 = vld [vmem:[#allocation5 + $0x3d8] sm:$0xff] }
  0xb0   :  { %806 = vmatpush.msrb.mxu1 %v209_v46  ;;  %829 = vmatpush.msrb.mxu2 %v273_v47  ;;  %v185_v14 = vld [vmem:[#allocation5 + $0x270] sm:$0xff]  ;;  %v158_v47 = vld [vmem:[#allocation5 + $0x198] sm:$0xff] }
  0xb1   :  { %851 = vmatpush.msrb.mxu3 %v341_v48  ;;  %784 = vmatpush.msrb.mxu0 %v141_v49  ;;  %v249_v15 = vld [vmem:[#allocation5 + $0x470] sm:$0xff]  ;;  %v226_v48 = vld [vmem:[#allocation5 + $0x3b8] sm:$0xff] }
  0xb2   :  { %807 = vmatpush.msrb.mxu1 %v205_v50  ;;  %830 = vmatpush.msrb.mxu2 %v269_v52  ;;  %v317_v16 = vld [vmem:[#allocation5 + $0x690] sm:$0xff]  ;;  %v154_v52 = vld [vmem:[#allocation5 + $0x178] sm:$0xff] }
  0xb3   :  { %852 = vmatpush.msrb.mxu3 %v337_v53  ;;  %785 = vmatpush.msrb.mxu0 %v137_v54  ;;  %v117_v17 = vld [vmem:[#allocation5 + $0x50] sm:$0xff]  ;;  %v222_v53 = vld [vmem:[#allocation5 + $0x398] sm:$0xff] }
  0xb4   :  { %808 = vmatpush.msrb.mxu1 %v201_v55  ;;  %831 = vmatpush.msrb.mxu2 %v265_v57  ;;  %v181_v18 = vld [vmem:[#allocation5 + $0x250] sm:$0xff]  ;;  %v150_v57 = vld [vmem:[#allocation5 + $0x158] sm:$0xff] }
  0xb5   :  { %853 = vmatpush.msrb.mxu3 %v333_v58  ;;  %786 = vmatpush.msrb.mxu0 %v133_v59  ;;  %v245_v19 = vld [vmem:[#allocation5 + $0x450] sm:$0xff]  ;;  %v218_v58 = vld [vmem:[#allocation5 + $0x378] sm:$0xff] }
  0xb6   :  { %809 = vmatpush.msrb.mxu1 %v197_v60  ;;  %832 = vmatpush.msrb.mxu2 %v261_v62  ;;  %v313_v20 = vld [vmem:[#allocation5 + $0x670] sm:$0xff]  ;;  %v146_v62 = vld [vmem:[#allocation5 + $0x138] sm:$0xff] }
  0xb7   :  { %854 = vmatpush.msrb.mxu3 %v329_v63  ;;  %787 = vmatpush.msrb.mxu0 %v129_v1  ;;  %v113_v22 = vld [vmem:[#allocation5 + $0x30] sm:$0xff]  ;;  %v214_v63 = vld [vmem:[#allocation5 + $0x358] sm:$0xff] }
  0xb8   :  { %810 = vmatpush.msrb.mxu1 %v193_v2  ;;  %833 = vmatpush.msrb.mxu2 %v257_v3  ;;  %v177_v23 = vld [vmem:[#allocation5 + $0x230] sm:$0xff]  ;;  %v142_v3 = vld [vmem:[#allocation5 + $0x118] sm:$0xff] }
  0xb9   :  { %855 = vmatpush.msrb.mxu3 %v325_v4  ;;  %788 = vmatpush.msrb.mxu0 %v125_v8  ;;  %v241_v24 = vld [vmem:[#allocation5 + $0x430] sm:$0xff]  ;;  %v210_v4 = vld [vmem:[#allocation5 + $0x338] sm:$0xff] }
  0xba   :  { %811 = vmatpush.msrb.mxu1 %v189_v9  ;;  %834 = vmatpush.msrb.mxu2 %v253_v10  ;;  %v309_v25 = vld [vmem:[#allocation5 + $0x650] sm:$0xff]  ;;  %v138_v10 = vld [vmem:[#allocation5 + $0xf8] sm:$0xff] }
  0xbb   :  { %856 = vmatpush.msrb.mxu3 %v321_v11  ;;  %789 = vmatpush.msrb.mxu0 %v121_v13  ;;  %v109_v28 = vld [vmem:[#allocation5 + $0x10] sm:$0xff]  ;;  %v206_v11 = vld [vmem:[#allocation5 + $0x318] sm:$0xff] }
  0xbc   :  { %812 = vmatpush.msrb.mxu1 %v185_v14  ;;  %835 = vmatpush.msrb.mxu2 %v249_v15  ;;  %v173_v29 = vld [vmem:[#allocation5 + $0x210] sm:$0xff]  ;;  %v134_v15 = vld [vmem:[#allocation5 + $0xd8] sm:$0xff] }
  0xbd   :  { %857 = vmatpush.msrb.mxu3 %v317_v16  ;;  %790 = vmatpush.msrb.mxu0 %v117_v17  ;;  %v237_v30 = vld [vmem:[#allocation5 + $0x410] sm:$0xff]  ;;  %v202_v16 = vld [vmem:[#allocation5 + $0x2f8] sm:$0xff] }
  0xbe   :  { %813 = vmatpush.msrb.mxu1 %v181_v18  ;;  %836 = vmatpush.msrb.mxu2 %v245_v19  ;;  %v305_v31 = vld [vmem:[#allocation5 + $0x630] sm:$0xff]  ;;  %v130_v19 = vld [vmem:[#allocation5 + $0xb8] sm:$0xff] }
  0xbf   :  { %858 = vmatpush.msrb.mxu3 %v313_v20  ;;  %791 = vmatpush.msrb.mxu0 %v113_v22  ;;  %v425_v33 = vld [vmem:[#allocation5 + $0x9f0] sm:$0xff]  ;;  %v198_v20 = vld [vmem:[#allocation5 + $0x2d8] sm:$0xff] }
  0xc0   :  { %814 = vmatpush.msrb.mxu1 %v177_v23  ;;  %837 = vmatpush.msrb.mxu2 %v241_v24  ;;  %v489_v34 = vld [vmem:[#allocation5 + $0xbf0] sm:$0xff]  ;;  %v126_v23 = vld [vmem:[#allocation5 + $0x98] sm:$0xff] }
  0xc1   :  { %859 = vmatpush.msrb.mxu3 %v309_v25  ;;  %792 = vmatpush.msrb.mxu0 %v109_v28  ;;  %v301_v36 = vld [vmem:[#allocation5 + $0x610] sm:$0xff]  ;;  %v194_v24 = vld [vmem:[#allocation5 + $0x2b8] sm:$0xff] }
  0xc2   :  { %815 = vmatpush.msrb.mxu1 %v173_v29  ;;  %838 = vmatpush.msrb.mxu2 %v237_v30  ;;  %v421_v37 = vld [vmem:[#allocation5 + $0x9d0] sm:$0xff]  ;;  %v122_v28 = vld [vmem:[#allocation5 + $0x78] sm:$0xff] }
  0xc3   :  { %860 = vmatpush.msrb.mxu3 %v305_v31  ;;  %v485_v38 = vld [vmem:[#allocation5 + $0xbd0] sm:$0xff]  ;;  %869 = vmatpush.msra.mxu0 %v425_v33  ;;  %v190_v29 = vld [vmem:[#allocation5 + $0x298] sm:$0xff] }
  0xc4   :  { %892 = vmatpush.msra.mxu1 %v489_v34  ;;  %915 = vmatpush.msra.mxu2 %v170_v35  ;;  %v417_v41 = vld [vmem:[#allocation5 + $0x9b0] sm:$0xff]  ;;  %v118_v33 = vld [vmem:[#allocation5 + $0x58] sm:$0xff] }
  0xc5   :  { %861 = vmatpush.msrb.mxu3 %v301_v36  ;;  %v481_v42 = vld [vmem:[#allocation5 + $0xbb0] sm:$0xff]  ;;  %870 = vmatpush.msra.mxu0 %v421_v37  ;;  %v186_v34 = vld [vmem:[#allocation5 + $0x278] sm:$0xff] }
  0xc6   :  { %893 = vmatpush.msra.mxu1 %v485_v38  ;;  %916 = vmatpush.msra.mxu2 %v166_v39  ;;  %v413_v45 = vld [vmem:[#allocation5 + $0x990] sm:$0xff]  ;;  %v114_v36 = vld [vmem:[#allocation5 + $0x38] sm:$0xff] }
  0xc7   :  { %938 = vmatpush.msra.mxu3 %v234_v40  ;;  %v477_v46 = vld [vmem:[#allocation5 + $0xb90] sm:$0xff]  ;;  %871 = vmatpush.msra.mxu0 %v417_v41  ;;  %v182_v37 = vld [vmem:[#allocation5 + $0x258] sm:$0xff] }
  0xc8   :  { %894 = vmatpush.msra.mxu1 %v481_v42  ;;  %917 = vmatpush.msra.mxu2 %v162_v43  ;;  %v409_v49 = vld [vmem:[#allocation5 + $0x970] sm:$0xff]  ;;  %v110_v38 = vld [vmem:[#allocation5 + $0x18] sm:$0xff] }
  0xc9   :  { %939 = vmatpush.msra.mxu3 %v230_v44  ;;  %v473_v50 = vld [vmem:[#allocation5 + $0xb70] sm:$0xff]  ;;  %872 = vmatpush.msra.mxu0 %v413_v45  ;;  %v178_v39 = vld [vmem:[#allocation5 + $0x238] sm:$0xff] }
  0xca   :  { %895 = vmatpush.msra.mxu1 %v477_v46  ;;  %918 = vmatpush.msra.mxu2 %v158_v47  ;;  %v405_v54 = vld [vmem:[#allocation5 + $0x950] sm:$0xff]  ;;  %v362_v40 = vld [vmem:[#allocation5 + $0x7f8] sm:$0xff] }
  0xcb   :  { %940 = vmatpush.msra.mxu3 %v226_v48  ;;  %v469_v55 = vld [vmem:[#allocation5 + $0xb50] sm:$0xff]  ;;  %873 = vmatpush.msra.mxu0 %v409_v49  ;;  %v426_v41 = vld [vmem:[#allocation5 + $0x9f8] sm:$0xff] }
  0xcc   :  { %896 = vmatpush.msra.mxu1 %v473_v50  ;;  %919 = vmatpush.msra.mxu2 %v154_v52  ;;  %v401_v59 = vld [vmem:[#allocation5 + $0x930] sm:$0xff]  ;;  %v174_v42 = vld [vmem:[#allocation5 + $0x218] sm:$0xff] }
  0xcd   :  { %941 = vmatpush.msra.mxu3 %v222_v53  ;;  %v465_v60 = vld [vmem:[#allocation5 + $0xb30] sm:$0xff]  ;;  %874 = vmatpush.msra.mxu0 %v405_v54  ;;  %v294_v43 = vld [vmem:[#allocation5 + $0x5d8] sm:$0xff] }
  0xce   :  { %897 = vmatpush.msra.mxu1 %v469_v55  ;;  %920 = vmatpush.msra.mxu2 %v150_v57  ;;  %v397_v1 = vld [vmem:[#allocation5 + $0x910] sm:$0xff]  ;;  %v358_v44 = vld [vmem:[#allocation5 + $0x7d8] sm:$0xff] }
  0xcf   :  { %942 = vmatpush.msra.mxu3 %v218_v58  ;;  %v461_v2 = vld [vmem:[#allocation5 + $0xb10] sm:$0xff]  ;;  %875 = vmatpush.msra.mxu0 %v401_v59  ;;  %v422_v45 = vld [vmem:[#allocation5 + $0x9d8] sm:$0xff] }
  0xd0   :  { %898 = vmatpush.msra.mxu1 %v465_v60  ;;  %921 = vmatpush.msra.mxu2 %v146_v62  ;;  %v457_v8 = vld [vmem:[#allocation5 + $0xaf0] sm:$0xff]  ;;  %v490_v46 = vld [vmem:[#allocation5 + $0xbf8] sm:$0xff] }
  0xd1   :  { %943 = vmatpush.msra.mxu3 %v214_v63  ;;  %876 = vmatpush.msra.mxu0 %v397_v1  ;;  %v393_v9 = vld [vmem:[#allocation5 + $0x8f0] sm:$0xff]  ;;  %v354_v47 = vld [vmem:[#allocation5 + $0x7b8] sm:$0xff] }
  0xd2   :  { %899 = vmatpush.msra.mxu1 %v461_v2  ;;  %922 = vmatpush.msra.mxu2 %v142_v3  ;;  %v389_v13 = vld [vmem:[#allocation5 + $0x8d0] sm:$0xff]  ;;  %v418_v48 = vld [vmem:[#allocation5 + $0x9b8] sm:$0xff] }
  0xd3   :  { %944 = vmatpush.msra.mxu3 %v210_v4  ;;  %793 = vmatmul.f32.vlgmr.msrb.gmra.mxu0 %v1642_v51  ;;  %v453_v14 = vld [vmem:[#allocation5 + $0xad0] sm:$0xff]  ;;  %v486_v49 = vld [vmem:[#allocation5 + $0xbd8] sm:$0xff] }
  0xd4   :  { %900 = vmatpush.msra.mxu1 %v457_v8  ;;  %877 = vmatpush.msra.mxu0 %v393_v9  ;;  %v385_v17 = vld [vmem:[#allocation5 + $0x8b0] sm:$0xff]  ;;  %v414_v50 = vld [vmem:[#allocation5 + $0x998] sm:$0xff] }
  0xd5   :  { %923 = vmatpush.msra.mxu2 %v138_v10  ;;  %945 = vmatpush.msra.mxu3 %v206_v11  ;;  %v449_v18 = vld [vmem:[#allocation5 + $0xab0] sm:$0xff]  ;;  %v482_v52 = vld [vmem:[#allocation5 + $0xbb8] sm:$0xff] }
  0xd6   :  { %816 = vmatmul.f32.vlgmr.msrb.gmra.mxu1 %v1644_v56  ;;  %878 = vmatpush.msra.mxu0 %v389_v13  ;;  %v381_v22 = vld [vmem:[#allocation5 + $0x890] sm:$0xff]  ;;  %v346_v53 = vld [vmem:[#allocation5 + $0x778] sm:$0xff] }
  0xd7   :  { %901 = vmatpush.msra.mxu1 %v453_v14  ;;  %924 = vmatpush.msra.mxu2 %v134_v15  ;;  %v445_v51 = vld [vmem:[#allocation5 + $0xa90] sm:$0xff]  ;;  %v410_v54 = vld [vmem:[#allocation5 + $0x978] sm:$0xff] }
  0xd8   :  { %946 = vmatpush.msra.mxu3 %v202_v16  ;;  %879 = vmatpush.msra.mxu0 %v385_v17  ;;  %v377_v56 = vld [vmem:[#allocation5 + $0x870] sm:$0xff]  ;;  %v478_v55 = vld [vmem:[#allocation5 + $0xb98] sm:$0xff]  ;;  %v1420_v17 = vld [vmem:[#allocation2] sm:$0xff] }
  0xd9   :  { %902 = vmatpush.msra.mxu1 %v449_v18  ;;  %925 = vmatpush.msra.mxu2 %v130_v19  ;;  %v441_v25 = vld [vmem:[#allocation5 + $0xa70] sm:$0xff]  ;;  %v278_v57 = vld [vmem:[#allocation5 + $0x558] sm:$0xff] }
  0xda   :  { %947 = vmatpush.msra.mxu3 %v198_v20  ;;  %839 = vmatmul.f32.vlgmr.msrb.gmra.mxu2 %v1648_v61  ;;  %v373_v30 = vld [vmem:[#allocation5 + $0x850] sm:$0xff]  ;;  %v342_v58 = vld [vmem:[#allocation5 + $0x758] sm:$0xff] }
  0xdb   :  { %880 = vmatpush.msra.mxu0 %v381_v22  ;;  %903 = vmatpush.msra.mxu1 %v445_v51  ;;  %v437_v31 = vld [vmem:[#allocation5 + $0xa50] sm:$0xff]  ;;  %v406_v59 = vld [vmem:[#allocation5 + $0x958] sm:$0xff] }
  0xdc   :  { %926 = vmatpush.msra.mxu2 %v126_v23  ;;  %948 = vmatpush.msra.mxu3 %v194_v24  ;;  %v369_v61 = vld [vmem:[#allocation5 + $0x830] sm:$0xff]  ;;  %v474_v60 = vld [vmem:[#allocation5 + $0xb78] sm:$0xff]  ;;  %v1704_v23 = vpop.f32.mrf.mxu1  ;;  %v1706_v24 = vpop.f32.mrf.mxu2 }
  0xdd   :  { %796 = vmatmul.f32.gmra.mxu0 %v1653_v6  ;;  %862 = vmatmul.f32.vlgmr.msrb.gmra.mxu3 %v1651_v5  ;;  %v433_v35 = vld [vmem:[#allocation5 + $0xa30] sm:$0xff]  ;;  %v274_v62 = vld [vmem:[#allocation5 + $0x538] sm:$0xff] }
  0xde   :  { %881 = vmatpush.msra.mxu0 %v377_v56  ;;  %904 = vmatpush.msra.mxu1 %v441_v25  ;;  %v365_v6 = vld [vmem:[#allocation5 + $0x810] sm:$0xff]  ;;  %v338_v63 = vld [vmem:[#allocation5 + $0x738] sm:$0xff]  ;;  %v1421_v56 = vld [vmem:[#allocation2 + $0x8] sm:$0xff] }
  0xdf   :  { %927 = vmatpush.msra.mxu2 %v122_v28  ;;  %949 = vmatpush.msra.mxu3 %v190_v29  ;;  %v429_v5 = vld [vmem:[#allocation5 + $0xa10] sm:$0xff]  ;;  %v402_v1 = vld [vmem:[#allocation5 + $0x938] sm:$0xff] }
  0xe0   :  { %819 = vmatmul.f32.gmra.mxu1 %v1657_v12  ;;  %882 = vmatpush.msra.mxu0 %v373_v30  ;;  %v298_v12 = vld [vmem:[#allocation5 + $0x5f8] sm:$0xff] }
  0xe1   :  { %905 = vmatpush.msra.mxu1 %v437_v31  ;;  %928 = vmatpush.msra.mxu2 %v118_v33  ;;  %v470_v2 = vld [vmem:[#allocation5 + $0xb58] sm:$0xff] }
  0xe2   :  { %950 = vmatpush.msra.mxu3 %v186_v34  ;;  %883 = vmatpush.msra.mxu0 %v369_v61  ;;  %v270_v3 = vld [vmem:[#allocation5 + $0x518] sm:$0xff]  ;;  %v1708_v34 = vpop.f32.mrf.mxu3 }
  0xe3   :  { %906 = vmatpush.msra.mxu1 %v433_v35  ;;  %929 = vmatpush.msra.mxu2 %v114_v36  ;;  %v334_v4 = vld [vmem:[#allocation5 + $0x718] sm:$0xff] }
  0xe4   :  { %951 = vmatpush.msra.mxu3 %v182_v37  ;;  %842 = vmatmul.f32.gmra.mxu2 %v1660_v21  ;;  %v290_v21 = vld [vmem:[#allocation5 + $0x5b8] sm:$0xff] }
  0xe5   :  { %884 = vmatpush.msra.mxu0 %v365_v6  ;;  %907 = vmatpush.msra.mxu1 %v429_v5  ;;  %v398_v8 = vld [vmem:[#allocation5 + $0x918] sm:$0xff]  ;;  %v1422_v5 = vld [vmem:[#allocation2 + $0x30] sm:$0xff] }
  0xe6   :  { %930 = vmatpush.msra.mxu2 %v110_v38  ;;  %952 = vmatpush.msra.mxu3 %v178_v39  ;;  %v466_v9 = vld [vmem:[#allocation5 + $0xb38] sm:$0xff] }
  0xe7   :  { %885 = vmatmul.f32.vlgmr.msra.gmra.mxu0 %v1662_v26  ;;  %865 = vmatmul.f32.gmra.mxu3 %v1665_v27  ;;  %v286_v26 = vld [vmem:[#allocation5 + $0x598] sm:$0xff] }
  0xe8   :  { %961 = vmatpush.msrb.mxu0 %v298_v12  ;;  %984 = vmatpush.msrb.mxu1 %v362_v40  ;;  %v350_v27 = vld [vmem:[#allocation5 + $0x798] sm:$0xff] }
  0xe9   :  { %1007 = vmatpush.msrb.mxu2 %v426_v41  ;;  %953 = vmatpush.msra.mxu3 %v174_v42  ;;  %v266_v10 = vld [vmem:[#allocation5 + $0x4f8] sm:$0xff] }
  0xea   :  { %908 = vmatmul.f32.vlgmr.msra.gmra.mxu1 %v1668_v32  ;;  %962 = vmatpush.msrb.mxu0 %v294_v43  ;;  %v282_v32 = vld [vmem:[#allocation5 + $0x578] sm:$0xff] }
  0xeb   :  { %985 = vmatpush.msrb.mxu1 %v358_v44  ;;  %1008 = vmatpush.msrb.mxu2 %v422_v45  ;;  %v330_v11 = vld [vmem:[#allocation5 + $0x6f8] sm:$0xff] }
  0xec   :  { %1030 = vmatpush.msrb.mxu3 %v490_v46  ;;  %963 = vmatpush.msrb.mxu0 %v290_v21  ;;  %v394_v13 = vld [vmem:[#allocation5 + $0x8f8] sm:$0xff] }
  0xed   :  { %986 = vmatpush.msrb.mxu1 %v354_v47  ;;  %1009 = vmatpush.msrb.mxu2 %v418_v48  ;;  %v462_v14 = vld [vmem:[#allocation5 + $0xb18] sm:$0xff] }
  0xee   :  { %1031 = vmatpush.msrb.mxu3 %v486_v49  ;;  %964 = vmatpush.msrb.mxu0 %v286_v26  ;;  %v262_v15 = vld [vmem:[#allocation5 + $0x4d8] sm:$0xff] }
  0xef   :  { %987 = vmatpush.msrb.mxu1 %v350_v27  ;;  %1010 = vmatpush.msrb.mxu2 %v414_v50  ;;  %v326_v18 = vld [vmem:[#allocation5 + $0x6d8] sm:$0xff] }
  0xf0   :  { %1032 = vmatpush.msrb.mxu3 %v482_v52  ;;  %888 = vmatmul.f32.gmra.mxu0 %v1674_v0  ;;  %v1702_v16 = vpop.f32.mrf.mxu0  ;;  %v390_v19 = vld [vmem:[#allocation5 + $0x8d8] sm:$0xff] }
  0xf1   :  { %988 = vmatpush.msrb.mxu1 %v346_v53  ;;  %965 = vmatpush.msrb.mxu0 %v282_v32  ;;  %v458_v20 = vld [vmem:[#allocation5 + $0xaf8] sm:$0xff]  ;;  %v1718_v32 = vld [vmem:[#allocation7] sm:$0xf] }
  0xf2   :  { %1011 = vmatpush.msrb.mxu2 %v410_v54  ;;  %1033 = vmatpush.msrb.mxu3 %v478_v55  ;;  %v258_v22 = vld [vmem:[#allocation5 + $0x4b8] sm:$0xff]  ;;  %v1424_v54 = vld [vmem:[#allocation2 + $0x10] sm:$0xff]  ;;  %v1425_v55 = vld [vmem:[#allocation2 + $0x20] sm:$0xff] }
  0xf3   :  { %911 = vmatmul.f32.gmra.mxu1 %v1678_v7  ;;  %966 = vmatpush.msrb.mxu0 %v278_v57  ;;  %v322_v51 = vld [vmem:[#allocation5 + $0x6b8] sm:$0xff]  ;;  %v1712_v46 = vpop.f32.mrf.mxu1  ;;  %v1089_v57 = vld [vmem:[#allocation8 + $0xe0] sm:$0xff] }
  0xf4   :  { %989 = vmatpush.msrb.mxu1 %v342_v58  ;;  %1012 = vmatpush.msrb.mxu2 %v406_v59  ;;  %v386_v25 = vld [vmem:[#allocation5 + $0x8b8] sm:$0xff]  ;;  %v1121_v58 = vld [vmem:[#allocation8 + $0x1e0] sm:$0xff] }
  0xf5   :  { %1034 = vmatpush.msrb.mxu3 %v474_v60  ;;  %967 = vmatpush.msrb.mxu0 %v274_v62  ;;  %v454_v28 = vld [vmem:[#allocation5 + $0xad8] sm:$0xff] }
  0xf6   :  { %990 = vmatpush.msrb.mxu1 %v338_v63  ;;  %1013 = vmatpush.msrb.mxu2 %v402_v1  ;;  %v254_v29 = vld [vmem:[#allocation5 + $0x498] sm:$0xff]  ;;  %v493_v63 = vperm.slane %v1718_v32, 0  ;;  %v1427_v1 = vld [vmem:[#allocation2 + $0x28] sm:$0xff] }
  0xf7   :  { %1035 = vmatpush.msrb.mxu3 %v470_v2  ;;  %968 = vmatpush.msrb.mxu0 %v270_v3  ;;  %v318_v30 = vld [vmem:[#allocation5 + $0x698] sm:$0xff]  ;;  %v1085_v3 = vld [vmem:[#allocation8 + $0xc0] sm:$0xff] }
  0xf8   :  { %991 = vmatpush.msrb.mxu1 %v334_v4  ;;  %1014 = vmatpush.msrb.mxu2 %v398_v8  ;;  %v382_v31 = vld [vmem:[#allocation5 + $0x898] sm:$0xff] }
  0xf9   :  { %1036 = vmatpush.msrb.mxu3 %v466_v9  ;;  %931 = vmatmul.f32.vlgmr.msra.gmra.mxu2 %v1420_v17  ;;  %v450_v33 = vld [vmem:[#allocation5 + $0xab8] sm:$0xff]  ;;  %v1710_v39 = vpop.f32.mrf.mxu0  ;;  %v1117_v9 = vld [vmem:[#allocation8 + $0x1c0] sm:$0xff]  ;;  %v494_v17 = vperm.slane %v1718_v32, 1 }
  0xfa   :  { %969 = vmatpush.msrb.mxu0 %v266_v10  ;;  %992 = vmatpush.msrb.mxu1 %v330_v11  ;;  %v250_v61 = vld [vmem:[#allocation5 + $0x478] sm:$0xff]  ;;  %v519_v11 = vadd.f32 %v1702_v16, %v493_v63 }
  0xfb   :  { %1015 = vmatpush.msrb.mxu2 %v394_v13  ;;  %1037 = vmatpush.msrb.mxu3 %v462_v14  ;;  %v314_v35 = vld [vmem:[#allocation5 + $0x678] sm:$0xff] }
  0xfc   :  { %970 = vmatpush.msrb.mxu0 %v262_v15  ;;  %954 = vmatmul.f32.vlgmr.msra.gmra.mxu3 %v1421_v56  ;;  %v378_v36 = vld [vmem:[#allocation5 + $0x878] sm:$0xff]  ;;  %v1428_v15 = vld [vmem:[#allocation2 + $0x40] sm:$0xff] }
  0xfd   :  { %993 = vmatpush.msrb.mxu1 %v326_v18  ;;  %1016 = vmatpush.msrb.mxu2 %v390_v19  ;;  %v446_v37 = vld [vmem:[#allocation5 + $0xa98] sm:$0xff]  ;;  %v1081_v18 = vld [vmem:[#allocation8 + $0xa0] sm:$0xff] }
  0xfe   :  { %1038 = vmatpush.msrb.mxu3 %v458_v20  ;;  %971 = vmatpush.msrb.mxu0 %v258_v22  ;;  %v246_v6 = vld [vmem:[#allocation5 + $0x458] sm:$0xff]  ;;  %v1113_v19 = vld [vmem:[#allocation8 + $0x1a0] sm:$0xff]  ;;  %v542_v22 = vadd.f32 %v1704_v23, %v519_v11 }
  0xff   :  { %994 = vmatpush.msrb.mxu1 %v322_v51  ;;  %1017 = vmatpush.msrb.mxu2 %v386_v25  ;;  %v310_v38 = vld [vmem:[#allocation5 + $0x658] sm:$0xff]  ;;  %v1429_v51 = vld [vmem:[#allocation2 + $0x48] sm:$0xff] }
 0x100   :  { %1039 = vmatpush.msrb.mxu3 %v454_v28  ;;  %972 = vmatpush.msrb.mxu0 %v254_v29  ;;  %v374_v12 = vld [vmem:[#allocation5 + $0x858] sm:$0xff]  ;;  %v1077_v29 = vld [vmem:[#allocation8 + $0x80] sm:$0xff]  ;;  %v565_v23 = vadd.f32 %v1706_v24, %v542_v22 }
 0x101   :  { %995 = vmatpush.msrb.mxu1 %v318_v30  ;;  %1018 = vmatpush.msrb.mxu2 %v382_v31  ;;  %v442_v40 = vld [vmem:[#allocation5 + $0xa78] sm:$0xff]  ;;  %v1109_v30 = vld [vmem:[#allocation8 + $0x180] sm:$0xff] }
 0x102   :  { %1040 = vmatpush.msrb.mxu3 %v450_v33  ;;  %934 = vmatmul.f32.gmra.mxu2 %v1422_v5  ;;  %v242_v41 = vld [vmem:[#allocation5 + $0x438] sm:$0xff]  ;;  %v1720_v59 = vpop.f32.mrf.mxu0  ;;  %v588_v5 = vadd.f32 %v1708_v34, %v565_v23 }
 0x103   :  { %973 = vmatpush.msrb.mxu0 %v250_v61  ;;  %996 = vmatpush.msrb.mxu1 %v314_v35  ;;  %v306_v42 = vld [vmem:[#allocation5 + $0x638] sm:$0xff] }
 0x104   :  { %1019 = vmatpush.msrb.mxu2 %v378_v36  ;;  %1041 = vmatpush.msrb.mxu3 %v446_v37  ;;  %v1423_v43 = vld [vmem:[#allocation2 + $0x38] sm:$0xff]  ;;  %v1073_v37 = vld [vmem:[#allocation8 + $0x60] sm:$0xff] }
 0x105   :  { %974 = vmatpush.msrb.mxu0 %v246_v6  ;;  %957 = vmatmul.f32.gmra.mxu3 %v1423_v43  ;;  %v370_v44 = vld [vmem:[#allocation5 + $0x838] sm:$0xff]  ;;  %v1714_v21 = vpop.f32.mrf.mxu2  ;;  %v1723_v4 = vpop.f32.mrf.mxu1  ;;  %v1105_v6 = vld [vmem:[#allocation8 + $0x160] sm:$0xff] }
 0x106   :  { %997 = vmatpush.msrb.mxu1 %v310_v38  ;;  %v438_v45 = vld [vmem:[#allocation5 + $0xa58] sm:$0xff]  ;;  %1020 = vmatpush.msrb.mxu2 %v374_v12 }
 0x107   :  { %1042 = vmatpush.msrb.mxu3 %v442_v40  ;;  %v238_v47 = vld [vmem:[#allocation5 + $0x418] sm:$0xff]  ;;  %975 = vmatpush.msrb.mxu0 %v242_v41  ;;  %v1069_v41 = vld [vmem:[#allocation8 + $0x40] sm:$0xff] }
 0x108   :  { %v302_v48 = vld [vmem:[#allocation5 + $0x618] sm:$0xff]  ;;  %998 = vmatpush.msrb.mxu1 %v306_v42  ;;  %1021 = vmatpush.msrb.mxu2 %v370_v44  ;;  %v1716_v27 = vpop.f32.mrf.mxu3  ;;  %v1101_v42 = vld [vmem:[#allocation8 + $0x140] sm:$0xff] }
 0x109   :  { %v366_v49 = vld [vmem:[#allocation5 + $0x818] sm:$0xff]  ;;  %1043 = vmatpush.msrb.mxu3 %v438_v45  ;;  %976 = vmatpush.msrb.mxu0 %v238_v47  ;;  %v611_v45 = vadd.f32 %v1720_v59, %v588_v5 }
 0x10a   :  { %v434_v26 = vld [vmem:[#allocation5 + $0xa38] sm:$0xff]  ;;  %999 = vmatpush.msrb.mxu1 %v302_v48  ;;  %1022 = vmatpush.msrb.mxu2 %v366_v49 }
 0x10b   :  { %v1091_v50 = vld [vmem:[#allocation8 + $0xf0] sm:$0xff]  ;;  %1044 = vmatpush.msrb.mxu3 %v434_v26  ;;  %977 = vmatmul.f32.vlgmr.msrb.gmra.mxu0 %v1424_v54  ;;  %v1092_v11 = vld [vmem:[#allocation8 + $0xf8] sm:$0xff] }
 0x10c   :  { %v1123_v52 = vld [vmem:[#allocation8 + $0x1f0] sm:$0xff]  ;;  %1023 = vmatmul.f32.vlgmr.msrb.gmra.mxu2 %v1425_v55  ;;  %1195 = vmatpush.msra.mxu0 %v1091_v50  ;;  %v1065_v50 = vld [vmem:[#allocation8 + $0x20] sm:$0xff]  ;;  %v1120_v22 = vld [vmem:[#allocation8 + $0x1d8] sm:$0xff] }
 0x10d   :  { %v430_v53 = vld [vmem:[#allocation5 + $0xa18] sm:$0xff]  ;;  %1218 = vmatpush.msra.mxu1 %v1123_v52  ;;  %v1097_v52 = vld [vmem:[#allocation8 + $0x120] sm:$0xff] }
 0x10e   :  { %1045 = vmatpush.msrb.mxu3 %v430_v53  ;;  %v1426_v60 = vld [vmem:[#allocation2 + $0x18] sm:$0xff]  ;;  %1196 = vmatpush.msra.mxu0 %v1089_v57  ;;  %v1153_v55 = vld [vmem:[#allocation8 + $0x2e0] sm:$0xff]  ;;  %v1742_v57 = vadd.f32 %v1723_v4, %v611_v45 }
 0x10f   :  { %1000 = vmatmul.f32.vlgmr.msrb.gmra.mxu1 %v1426_v60  ;;  %v1087_v62 = vld [vmem:[#allocation8 + $0xd0] sm:$0xff]  ;;  %1046 = vmatmul.f32.vlgmr.msrb.gmra.mxu3 %v1427_v1  ;;  %v656_v8 = vpop.f32.mrf.mxu2  ;;  %v1093_v1 = vld [vmem:[#allocation8 + $0x100] sm:$0xff]  ;;  %v1116_v23 = vld [vmem:[#allocation8 + $0x1b8] sm:$0xff] }
 0x110   :  { %v1119_v2 = vld [vmem:[#allocation8 + $0x1d0] sm:$0xff]  ;;  %1219 = vmatpush.msra.mxu1 %v1121_v58  ;;  %1197 = vmatpush.msra.mxu0 %v1087_v62  ;;  %v657_v25 = vadd.f32 %v656_v8, %v494_v17  ;;  %v1080_v5 = vld [vmem:[#allocation8 + $0x98] sm:$0xff] }
 0x111   :  { %v1083_v10 = vld [vmem:[#allocation8 + $0xb0] sm:$0xff]  ;;  %v1104_v45 = vld [vmem:[#allocation8 + $0x158] sm:$0xff] }
 0x112   :  { %1220 = vmatpush.msra.mxu1 %v1119_v2  ;;  %1198 = vmatpush.msra.mxu0 %v1085_v3  ;;  %v1115_v13 = vld [vmem:[#allocation8 + $0x1b0] sm:$0xff]  ;;  %v679_v14 = vpop.f32.mrf.mxu3  ;;  %v1124_v3 = vld [vmem:[#allocation8 + $0x1f8] sm:$0xff] }
 0x113   :  { %980 = vmatmul.f32.gmra.mxu0 %v1428_v15  ;;  %v1079_v16 = vld [vmem:[#allocation8 + $0x90] sm:$0xff] }
 0x114   :  { %1221 = vmatpush.msra.mxu1 %v1117_v9  ;;  %1026 = vmatmul.f32.gmra.mxu2 %v1674_v0  ;;  %v1111_v56 = vld [vmem:[#allocation8 + $0x190] sm:$0xff]  ;;  %v522_v0 = vadd.f32 %v1710_v39, %v493_v63  ;;  %v1061_v63 = vld [vmem:[#allocation8] sm:$0xff] }
 0x115   :  { %1199 = vmatpush.msra.mxu0 %v1083_v10  ;;  %v1728_v20 = vpop.f32.mrf.mxu0  ;;  %v1075_v33 = vld [vmem:[#allocation8 + $0x70] sm:$0xff]  ;;  %v1149_v9 = vld [vmem:[#allocation8 + $0x2c0] sm:$0xff]  ;;  %v1053_v10 = vmax.f32 %v1742_v57, 0.0  ;;  %v1142_v57 = vld [vmem:[#allocation8 + $0x288] sm:$0xff] }
 0x116   :  { %1222 = vmatpush.msra.mxu1 %v1115_v13  ;;  %v1107_v61 = vld [vmem:[#allocation8 + $0x170] sm:$0xff]  ;;  %v545_v36 = vadd.f32 %v1712_v46, %v522_v0  ;;  %v1122_v13 = vld [vmem:[#allocation8 + $0x1e8] sm:$0xff] }
 0x117   :  { %1003 = vmatmul.f32.gmra.mxu1 %v1429_v51  ;;  %1049 = vmatmul.f32.gmra.mxu3 %v1678_v7  ;;  %v680_v7 = vadd.f32 %v679_v14, %v657_v25  ;;  %v1071_v38 = vld [vmem:[#allocation8 + $0x50] sm:$0xff]  ;;  %v1145_v51 = vld [vmem:[#allocation8 + $0x2a0] sm:$0xff]  ;;  %v1118_v25 = vld [vmem:[#allocation8 + $0x1c8] sm:$0xff] }
 0x118   :  { %1200 = vmatpush.msra.mxu0 %v1081_v18  ;;  %1223 = vmatpush.msra.mxu1 %v1113_v19  ;;  %v1732_v28 = vpop.f32.mrf.mxu1  ;;  %v659_v31 = vpop.f32.mrf.mxu2  ;;  %v1103_v39 = vld [vmem:[#allocation8 + $0x150] sm:$0xff]  ;;  %v568_v40 = vadd.f32 %v1714_v21, %v545_v36  ;;  %v1082_v36 = vld [vmem:[#allocation8 + $0xa8] sm:$0xff] }
 0x119   :  { %v660_v43 = vadd.f32 %v659_v31, %v494_v17  ;;  %v1067_v46 = vld [vmem:[#allocation8 + $0x30] sm:$0xff]  ;;  %v1090_v17 = vld [vmem:[#allocation8 + $0xe8] sm:$0xff] }
 0x11a   :  { %1201 = vmatpush.msra.mxu0 %v1079_v16  ;;  %1224 = vmatpush.msra.mxu1 %v1111_v56  ;;  %v1099_v47 = vld [vmem:[#allocation8 + $0x130] sm:$0xff]  ;;  %v591_v26 = vadd.f32 %v1716_v27, %v568_v40  ;;  %v1088_v16 = vld [vmem:[#allocation8 + $0xd8] sm:$0xff] }
 0x11b   :  { %v682_v35 = vpop.f32.mrf.mxu3  ;;  %v1155_v49 = vld [vmem:[#allocation8 + $0x2f0] sm:$0xff] }
 0x11c   :  { %1202 = vmatpush.msra.mxu0 %v1077_v29  ;;  %1225 = vmatpush.msra.mxu1 %v1109_v30  ;;  %v683_v53 = vadd.f32 %v682_v35, %v660_v43  ;;  %v1063_v58 = vld [vmem:[#allocation8 + $0x10] sm:$0xff]  ;;  %v614_v62 = vadd.f32 %v1728_v20, %v591_v26  ;;  %v1086_v30 = vld [vmem:[#allocation8 + $0xc8] sm:$0xff]  ;;  %v1141_v35 = vld [vmem:[#allocation8 + $0x280] sm:$0xff] }
 0x11d   :  { %1241 = vmatpush.msra.mxu2 %v1155_v49  ;;  %v1095_v59 = vld [vmem:[#allocation8 + $0x110] sm:$0xff]  ;;  %v1133_v43 = vld [vmem:[#allocation8 + $0x240] sm:$0xff]  ;;  %v1070_v49 = vld [vmem:[#allocation8 + $0x48] sm:$0xff] }
 0x11e   :  { %1203 = vmatpush.msra.mxu0 %v1075_v33  ;;  %1226 = vmatpush.msra.mxu1 %v1107_v61  ;;  %v1151_v27 = vld [vmem:[#allocation8 + $0x2d0] sm:$0xff]  ;;  %v1750_v15 = vadd.f32 %v1732_v28, %v614_v62  ;;  %v1084_v33 = vld [vmem:[#allocation8 + $0xb8] sm:$0xff] }
 0x11f   :  { %v702_v12 = vpop.f32.mrf.mxu0  ;;  %1242 = vmatpush.msra.mxu2 %v1153_v55  ;;  %v1147_v20 = vld [vmem:[#allocation8 + $0x2b0] sm:$0xff]  ;;  %v1100_v26 = vld [vmem:[#allocation8 + $0x138] sm:$0xff]  ;;  %v1066_v55 = vld [vmem:[#allocation8 + $0x28] sm:$0xff] }
 0x120   :  { %1204 = vmatpush.msra.mxu0 %v1073_v37  ;;  %1227 = vmatpush.msra.mxu1 %v1105_v6  ;;  %v703_v24 = vadd.f32 %v702_v12, %v680_v7  ;;  %v1143_v0 = vld [vmem:[#allocation8 + $0x290] sm:$0xff]  ;;  %v1057_v29 = vmax.f32 %v1750_v15, 0.0  ;;  %v1114_v7 = vld [vmem:[#allocation8 + $0x1a8] sm:$0xff]  ;;  %v1112_v37 = vld [vmem:[#allocation8 + $0x198] sm:$0xff] }
 0x121   :  { %1243 = vmatpush.msra.mxu2 %v1151_v27  ;;  %v1139_v6 = vld [vmem:[#allocation8 + $0x270] sm:$0xff]  ;;  %v1078_v12 = vld [vmem:[#allocation8 + $0x88] sm:$0xff]  ;;  %v1096_v27 = vld [vmem:[#allocation8 + $0x118] sm:$0xff] }
 0x122   :  { %1205 = vmatpush.msra.mxu0 %v1071_v38  ;;  %1228 = vmatpush.msra.mxu1 %v1103_v39  ;;  %v725_v44 = vpop.f32.mrf.mxu1  ;;  %v748_v34 = vpop.f32.mrf.mxu2  ;;  %v1110_v38 = vld [vmem:[#allocation8 + $0x188] sm:$0xff]  ;;  %v1137_v39 = vld [vmem:[#allocation8 + $0x260] sm:$0xff]  ;;  %v1135_v40 = vld [vmem:[#allocation8 + $0x250] sm:$0xff] }
 0x123   :  { %v726_v48 = vadd.f32 %v725_v44, %v703_v24  ;;  %1244 = vmatpush.msra.mxu2 %v1149_v9  ;;  %v1108_v24 = vld [vmem:[#allocation8 + $0x178] sm:$0xff]  ;;  %v1074_v44 = vld [vmem:[#allocation8 + $0x68] sm:$0xff]  ;;  %v1181_v9 = vld [vmem:[#allocation8 + $0x3c0] sm:$0xff] }
 0x124   :  { %1206 = vmatpush.msra.mxu0 %v1069_v41  ;;  %1229 = vmatpush.msra.mxu1 %v1101_v42  ;;  %v1076_v41 = vld [vmem:[#allocation8 + $0x78] sm:$0xff]  ;;  %v1106_v42 = vld [vmem:[#allocation8 + $0x168] sm:$0xff] }
 0x125   :  { %v749_v21 = vadd.f32 %v748_v34, %v726_v48  ;;  %v771_v54 = vpop.f32.mrf.mxu3  ;;  %1245 = vmatpush.msra.mxu2 %v1147_v20  ;;  %v1102_v48 = vld [vmem:[#allocation8 + $0x148] sm:$0xff]  ;;  %v1129_v34 = vld [vmem:[#allocation8 + $0x220] sm:$0xff]  ;;  %v1064_v62 = vld [vmem:[#allocation8 + $0x18] sm:$0xff] }
 0x126   :  { %1207 = vmatpush.msra.mxu0 %v1067_v46  ;;  %1230 = vmatpush.msra.mxu1 %v1099_v47  ;;  %v1131_v46 = vld [vmem:[#allocation8 + $0x230] sm:$0xff]  ;;  %v1072_v47 = vld [vmem:[#allocation8 + $0x58] sm:$0xff] }
 0x127   :  { %v1744_v60 = vadd.f32 %v771_v54, %v749_v21  ;;  %1246 = vmatpush.msra.mxu2 %v1145_v51  ;;  %v1068_v21 = vld [vmem:[#allocation8 + $0x38] sm:$0xff]  ;;  %v1125_v54 = vld [vmem:[#allocation8 + $0x200] sm:$0xff] }
 0x128   :  { %1208 = vmatpush.msra.mxu0 %v1065_v50  ;;  %1231 = vmatpush.msra.mxu1 %v1097_v52  ;;  %v1127_v50 = vld [vmem:[#allocation8 + $0x210] sm:$0xff]  ;;  %v1144_v20 = vld [vmem:[#allocation8 + $0x298] sm:$0xff]  ;;  %v1173_v51 = vld [vmem:[#allocation8 + $0x380] sm:$0xff] }
 0x129   :  { %v705_v2 = vpop.f32.mrf.mxu0  ;;  %v1054_v4 = vmax.f32 %v1744_v60, 0.0  ;;  %1247 = vmatpush.msra.mxu2 %v1143_v0  ;;  %v1187_v52 = vld [vmem:[#allocation8 + $0x3f0] sm:$0xff] }
 0x12a   :  { %1209 = vmatpush.msra.mxu0 %v1063_v58  ;;  %1232 = vmatpush.msra.mxu1 %v1095_v59  ;;  %v706_v8 = vadd.f32 %v705_v2, %v683_v53  ;;  %v1098_v53 = vld [vmem:[#allocation8 + $0x128] sm:$0xff]  ;;  %v1156_v58 = vld [vmem:[#allocation8 + $0x2f8] sm:$0xff]  ;;  %v1185_v59 = vld [vmem:[#allocation8 + $0x3e0] sm:$0xff] }
 0x12b   :  { %1248 = vmatpush.msra.mxu2 %v1141_v35  ;;  %1264 = vmatpush.msra.mxu3 %v1187_v52  ;;  %v1062_v2 = vld [vmem:[#allocation8 + $0x8] sm:$0xff]  ;;  %v1167_v0 = vld [vmem:[#allocation8 + $0x350] sm:$0xff] }
 0x12c   :  { %1210 = vmatpush.msra.mxu0 %v1061_v63  ;;  %1233 = vmatpush.msra.mxu1 %v1093_v1  ;;  %v728_v14 = vpop.f32.mrf.mxu1  ;;  %v751_v19 = vpop.f32.mrf.mxu2  ;;  %v1154_v63 = vld [vmem:[#allocation8 + $0x2e8] sm:$0xff]  ;;  %v1163_v35 = vld [vmem:[#allocation8 + $0x330] sm:$0xff] }
 0x12d   :  { %1211 = vmatmul.f32.vlgmr.msra.gmra.mxu0 %v1053_v10  ;;  %v729_v18 = vadd.f32 %v728_v14, %v706_v8  ;;  %1234 = vmatmul.f32.vlgmr.msra.gmra.mxu1 %v1054_v4  ;;  %v1094_v1 = vld [vmem:[#allocation8 + $0x108] sm:$0xff]  ;;  %v1183_v8 = vld [vmem:[#allocation8 + $0x3d0] sm:$0xff]  ;;  %v1148_v14 = vld [vmem:[#allocation8 + $0x2b8] sm:$0xff] }
 0x12e   :  { %1310 = vmatpush.msrb.mxu1 %v1124_v3  ;;  %1287 = vmatpush.msrb.mxu0 %v1092_v11  ;;  %v1152_v3 = vld [vmem:[#allocation8 + $0x2d8] sm:$0xff]  ;;  %v1150_v11 = vld [vmem:[#allocation8 + $0x2c8] sm:$0xff] }
 0x12f   :  { %v752_v56 = vadd.f32 %v751_v19, %v729_v18  ;;  %v774_v28 = vpop.f32.mrf.mxu3  ;;  %1249 = vmatpush.msra.mxu2 %v1139_v6  ;;  %1265 = vmatpush.msra.mxu3 %v1185_v59  ;;  %v1146_v18 = vld [vmem:[#allocation8 + $0x2a8] sm:$0xff]  ;;  %v1180_v59 = vld [vmem:[#allocation8 + $0x3b8] sm:$0xff] }
 0x130   :  { %1311 = vmatpush.msrb.mxu1 %v1122_v13  ;;  %1288 = vmatpush.msrb.mxu0 %v1090_v17  ;;  %v1179_v13 = vld [vmem:[#allocation8 + $0x3b0] sm:$0xff]  ;;  %v1177_v17 = vld [vmem:[#allocation8 + $0x3a0] sm:$0xff] }
 0x131   :  { %v1757_v31 = vadd.f32 %v774_v28, %v752_v56  ;;  %1250 = vmatpush.msra.mxu2 %v1137_v39  ;;  %1266 = vmatpush.msra.mxu3 %v1183_v8  ;;  %v1138_v28 = vld [vmem:[#allocation8 + $0x268] sm:$0xff]  ;;  %v1159_v39 = vld [vmem:[#allocation8 + $0x310] sm:$0xff] }
 0x132   :  { %1312 = vmatpush.msrb.mxu1 %v1120_v22  ;;  %1289 = vmatpush.msrb.mxu0 %v1088_v16  ;;  %v495_v22 = vperm.slane %v1718_v32, 2  ;;  %v1140_v16 = vld [vmem:[#allocation8 + $0x278] sm:$0xff]  ;;  %v1170_v8 = vld [vmem:[#allocation8 + $0x368] sm:$0xff] }
 0x133   :  { %v1058_v61 = vmax.f32 %v1757_v31, 0.0  ;;  %1251 = vmatpush.msra.mxu2 %v1135_v40  ;;  %1267 = vmatpush.msra.mxu3 %v1181_v9  ;;  %v1157_v40 = vld [vmem:[#allocation8 + $0x300] sm:$0xff] }
 0x134   :  { %1313 = vmatpush.msrb.mxu1 %v1118_v25  ;;  %1290 = vmatpush.msrb.mxu0 %v1086_v30  ;;  %v1169_v25 = vld [vmem:[#allocation8 + $0x360] sm:$0xff] }
 0x135   :  { %1214 = vmatmul.f32.gmra.mxu0 %v1057_v29  ;;  %1237 = vmatmul.f32.gmra.mxu1 %v1058_v61 }
 0x136   :  { %1314 = vmatpush.msrb.mxu1 %v1116_v23  ;;  %1291 = vmatpush.msrb.mxu0 %v1084_v33  ;;  %v1136_v23 = vld [vmem:[#allocation8 + $0x258] sm:$0xff]  ;;  %v1165_v33 = vld [vmem:[#allocation8 + $0x340] sm:$0xff] }
 0x137   :  { %1252 = vmatpush.msra.mxu2 %v1133_v43  ;;  %1268 = vmatpush.msra.mxu3 %v1179_v13  ;;  %v1166_v13 = vld [vmem:[#allocation8 + $0x348] sm:$0xff] }
 0x138   :  { %1315 = vmatpush.msrb.mxu1 %v1114_v7  ;;  %1292 = vmatpush.msrb.mxu0 %v1082_v36  ;;  %v1132_v7 = vld [vmem:[#allocation8 + $0x238] sm:$0xff] }
 0x139   :  { %1253 = vmatpush.msra.mxu2 %v1131_v46  ;;  %1269 = vmatpush.msra.mxu3 %v1177_v17  ;;  %v1188_v46 = vld [vmem:[#allocation8 + $0x3f8] sm:$0xff]  ;;  %v496_v17 = vperm.slane %v1718_v32, 3 }
 0x13a   :  { %1316 = vmatpush.msrb.mxu1 %v1112_v37  ;;  %1293 = vmatpush.msrb.mxu0 %v1080_v5  ;;  %v1130_v37 = vld [vmem:[#allocation8 + $0x228] sm:$0xff] }
 0x13b   :  { %1254 = vmatpush.msra.mxu2 %v1129_v34 }
 0x13c   :  { %1317 = vmatpush.msrb.mxu1 %v1110_v38  ;;  %1294 = vmatpush.msrb.mxu0 %v1078_v12  ;;  %v1161_v38 = vld [vmem:[#allocation8 + $0x320] sm:$0xff] }
 0x13d   :  { %1255 = vmatpush.msra.mxu2 %v1127_v50 }
 0x13e   :  { %1318 = vmatpush.msrb.mxu1 %v1108_v24  ;;  %1295 = vmatpush.msrb.mxu0 %v1076_v41  ;;  %v1128_v24 = vld [vmem:[#allocation8 + $0x218] sm:$0xff] }
 0x13f   :  { %1256 = vmatpush.msra.mxu2 %v1125_v54 }
 0x140   :  { %1319 = vmatpush.msrb.mxu1 %v1106_v42  ;;  %1296 = vmatpush.msrb.mxu0 %v1074_v44  ;;  %v1126_v42 = vld [vmem:[#allocation8 + $0x208] sm:$0xff] }
 0x141   :  { %1333 = vmatpush.msrb.mxu2 %v1156_v58 }
 0x142   :  { %1320 = vmatpush.msrb.mxu1 %v1104_v45  ;;  %1297 = vmatpush.msrb.mxu0 %v1072_v47 }
 0x143   :  { %1334 = vmatpush.msrb.mxu2 %v1154_v63  ;;  %v1178_v63 = vld [vmem:[#allocation8 + $0x3a8] sm:$0xff] }
 0x144   :  { %1321 = vmatpush.msrb.mxu1 %v1102_v48  ;;  %1298 = vmatpush.msrb.mxu0 %v1070_v49 }
 0x145   :  { %1335 = vmatpush.msrb.mxu2 %v1152_v3  ;;  %v1172_v3 = vld [vmem:[#allocation8 + $0x378] sm:$0xff] }
 0x146   :  { %1322 = vmatpush.msrb.mxu1 %v1100_v26  ;;  %1299 = vmatpush.msrb.mxu0 %v1068_v21  ;;  %v1186_v26 = vld [vmem:[#allocation8 + $0x3e8] sm:$0xff]  ;;  %v1184_v21 = vld [vmem:[#allocation8 + $0x3d8] sm:$0xff] }
 0x147   :  { %1336 = vmatpush.msrb.mxu2 %v1150_v11  ;;  %v1168_v11 = vld [vmem:[#allocation8 + $0x358] sm:$0xff] }
 0x148   :  { %1323 = vmatpush.msrb.mxu1 %v1098_v53  ;;  %1300 = vmatpush.msrb.mxu0 %v1066_v55  ;;  %v1182_v53 = vld [vmem:[#allocation8 + $0x3c8] sm:$0xff] }
 0x149   :  { %1337 = vmatpush.msrb.mxu2 %v1148_v14  ;;  %v1164_v14 = vld [vmem:[#allocation8 + $0x338] sm:$0xff] }
 0x14a   :  { %1324 = vmatpush.msrb.mxu1 %v1096_v27  ;;  %1301 = vmatpush.msrb.mxu0 %v1064_v62 }
 0x14b   :  { %1338 = vmatpush.msrb.mxu2 %v1146_v18 }
 0x14c   :  { %1325 = vmatpush.msrb.mxu1 %v1094_v1  ;;  %1302 = vmatpush.msrb.mxu0 %v1062_v2  ;;  %v1176_v1 = vld [vmem:[#allocation8 + $0x398] sm:$0xff]  ;;  %v1174_v2 = vld [vmem:[#allocation8 + $0x388] sm:$0xff] }
 0x14d   :  { %1326 = vmatmul.f32.vlgmr.msrb.gmra.mxu1 %v1054_v4  ;;  %1303 = vmatmul.f32.vlgmr.msrb.gmra.mxu0 %v1053_v10  ;;  %v1175_v4 = vld [vmem:[#allocation8 + $0x390] sm:$0xff] }
 0x14e   :  { %1270 = vmatpush.msra.mxu3 %v1175_v4  ;;  %1339 = vmatpush.msrb.mxu2 %v1144_v20  ;;  %v1171_v10 = vld [vmem:[#allocation8 + $0x370] sm:$0xff]  ;;  %v1160_v20 = vld [vmem:[#allocation8 + $0x318] sm:$0xff] }
 0x150   :  { %v794_v19 = vpop.f32.mrf.mxu0  ;;  %1271 = vmatpush.msra.mxu3 %v1173_v51  ;;  %1340 = vmatpush.msrb.mxu2 %v1142_v57 }
 0x151   :  { %v795_v56 = vadd.f32 %v794_v19, %v495_v22  ;;  %v1162_v19 = vld [vmem:[#allocation8 + $0x328] sm:$0xff] }
 0x152   :  { %1272 = vmatpush.msra.mxu3 %v1171_v10  ;;  %1341 = vmatpush.msrb.mxu2 %v1140_v16 }
 0x153   :  { %v817_v60 = vpop.f32.mrf.mxu1 }
 0x154   :  { %1273 = vmatpush.msra.mxu3 %v1169_v25  ;;  %v818_v31 = vadd.f32 %v817_v60, %v795_v56  ;;  %1342 = vmatpush.msrb.mxu2 %v1138_v28  ;;  %v1158_v60 = vld [vmem:[#allocation8 + $0x308] sm:$0xff] }
 0x155   :  { %1329 = vmatmul.f32.gmra.mxu1 %v1058_v61  ;;  %1306 = vmatmul.f32.gmra.mxu0 %v1057_v29  ;;  %v1134_v61 = vld [vmem:[#allocation8 + $0x248] sm:$0xff] }
 0x156   :  { %1274 = vmatpush.msra.mxu3 %v1167_v0  ;;  %1343 = vmatpush.msrb.mxu2 %v1136_v23 }
 0x158   :  { %1275 = vmatpush.msra.mxu3 %v1165_v33  ;;  %1344 = vmatpush.msrb.mxu2 %v1134_v61 }
 0x15a   :  { %v797_v30 = vpop.f32.mrf.mxu0  ;;  %1276 = vmatpush.msra.mxu3 %v1163_v35  ;;  %1345 = vmatpush.msrb.mxu2 %v1132_v7 }
 0x15b   :  { %v798_v6 = vadd.f32 %v797_v30, %v495_v22 }
 0x15c   :  { %1277 = vmatpush.msra.mxu3 %v1161_v38  ;;  %1346 = vmatpush.msrb.mxu2 %v1130_v37  ;;  %v1189_v38 = vld [vmem:[#allocation10] sm:$0x3] }
 0x15d   :  { %v820_v15 = vpop.f32.mrf.mxu1  ;;  %v840_v29 = vpop.f32.mrf.mxu2 }
 0x15e   :  { %v841_v36 = vadd.f32 %v840_v29, %v818_v31  ;;  %1278 = vmatpush.msra.mxu3 %v1159_v39  ;;  %v821_v43 = vadd.f32 %v820_v15, %v798_v6  ;;  %1347 = vmatpush.msrb.mxu2 %v1128_v24 }
 0x160   :  { %v863_v5 = vpop.f32.mrf.mxu3  ;;  %1279 = vmatpush.msra.mxu3 %v1157_v40  ;;  %1348 = vmatpush.msrb.mxu2 %v1126_v42  ;;  %v1191_v40 = vperm.slane %v1189_v38, 0 }
 0x161   :  { %v864_v12 = vadd.f32 %v863_v5, %v841_v36 }
 0x162   :  { %1356 = vmatpush.msrb.mxu3 %v1188_v46 }
 0x164   :  { %v886_v41 = vpop.f32.mrf.mxu0  ;;  %1357 = vmatpush.msrb.mxu3 %v1186_v26 }
 0x165   :  { %v887_v44 = vadd.f32 %v886_v41, %v864_v12 }
 0x166   :  { %1358 = vmatpush.msrb.mxu3 %v1184_v21 }
 0x167   :  { %v909_v45 = vpop.f32.mrf.mxu1  ;;  %v843_v48 = vpop.f32.mrf.mxu2 }
 0x168   :  { %v910_v47 = vadd.f32 %v909_v45, %v887_v44  ;;  %v844_v34 = vadd.f32 %v843_v48, %v821_v43  ;;  %1359 = vmatpush.msrb.mxu3 %v1182_v53 }
 0x16a   :  { %v1055_v49 = vmax.f32 %v910_v47, 0.0  ;;  %v866_v50 = vpop.f32.mrf.mxu3  ;;  %1360 = vmatpush.msrb.mxu3 %v1180_v59 }
 0x16b   :  { %v867_v52 = vadd.f32 %v866_v50, %v844_v34 }
 0x16c   :  { %1257 = vmatmul.f32.vlgmr.msra.gmra.mxu2 %v1055_v49  ;;  %1361 = vmatpush.msrb.mxu3 %v1178_v63 }
 0x16d   :  { %v889_v54 = vpop.f32.mrf.mxu0 }
 0x16e   :  { %v890_v55 = vadd.f32 %v889_v54, %v867_v52  ;;  %1362 = vmatpush.msrb.mxu3 %v1176_v1  ;;  %v1192_v52 = vperm.slane %v1189_v38, 1 }
 0x170   :  { %v912_v58 = vpop.f32.mrf.mxu1  ;;  %1363 = vmatpush.msrb.mxu3 %v1174_v2 }
 0x171   :  { %v913_v27 = vadd.f32 %v912_v58, %v890_v55 }
 0x172   :  { %1364 = vmatpush.msrb.mxu3 %v1172_v3 }
 0x173   :  { %v1059_v62 = vmax.f32 %v913_v27, 0.0 }
 0x174   :  { %1365 = vmatpush.msrb.mxu3 %v1170_v8 }
 0x175   :  { %1260 = vmatmul.f32.gmra.mxu2 %v1059_v62 }
 0x176   :  { %1366 = vmatpush.msrb.mxu3 %v1168_v11 }
 0x178   :  { %1367 = vmatpush.msrb.mxu3 %v1166_v13 }
 0x17a   :  { %1368 = vmatpush.msrb.mxu3 %v1164_v14 }
 0x17c   :  { %v932_v9 = vpop.f32.mrf.mxu2  ;;  %1369 = vmatpush.msrb.mxu3 %v1162_v19 }
 0x17d   :  { %1349 = vmatmul.f32.vlgmr.msrb.gmra.mxu2 %v1055_v49  ;;  %v933_v22 = vadd.f32 %v932_v9, %v496_v17 }
 0x17e   :  { %1370 = vmatpush.msrb.mxu3 %v1160_v20 }
 0x17f   :  { %v955_v18 = vpop.f32.mrf.mxu3 }
 0x180   :  { %v956_v51 = vadd.f32 %v955_v18, %v933_v22  ;;  %1371 = vmatpush.msrb.mxu3 %v1158_v60 }
 0x185   :  { %1352 = vmatmul.f32.gmra.mxu2 %v1059_v62  ;;  %v935_v4 = vpop.f32.mrf.mxu2 }
 0x186   :  { %v936_v25 = vadd.f32 %v935_v4, %v496_v17 }
 0x188   :  { %v958_v57 = vpop.f32.mrf.mxu3  ;;  %v978_v10 = vpop.f32.mrf.mxu0 }
 0x189   :  { %v979_v16 = vadd.f32 %v978_v10, %v956_v51  ;;  %v959_v30 = vadd.f32 %v958_v57, %v936_v25 }
 0x18c   :  { %v1001_v56 = vpop.f32.mrf.mxu1 }
 0x18d   :  { %v1002_v28 = vadd.f32 %v1001_v56, %v979_v16 }
 0x18f   :  { %v1024_v32 = vpop.f32.mrf.mxu2 }
 0x190   :  { %v1025_v0 = vadd.f32 %v1024_v32, %v1002_v28  ;;  %v981_v23 = vpop.f32.mrf.mxu0 }
 0x191   :  { %v982_v33 = vadd.f32 %v981_v23, %v959_v30 }
 0x192   :  { %v1047_v31 = vpop.f32.mrf.mxu3 }
 0x193   :  { %v1048_v61 = vadd.f32 %v1047_v31, %v1025_v0 }
 0x194   :  { %v1004_v15 = vpop.f32.mrf.mxu1 }
 0x195   :  { %v1056_v29 = vmax.f32 %v1048_v61, 0.0  ;;  %v1005_v7 = vadd.f32 %v1004_v15, %v982_v33 }
 0x197   :  { %1280 = vmatmul.f32.vlgmr.msra.gmra.mxu3 %v1056_v29  ;;  %v1027_v35 = vpop.f32.mrf.mxu2 }
 0x198   :  { %v1028_v36 = vadd.f32 %v1027_v35, %v1005_v7 }
 0x19a   :  { %v1050_v37 = vpop.f32.mrf.mxu3 }
 0x19b   :  { %v1051_v6 = vadd.f32 %v1050_v37, %v1028_v36 }
 0x19d   :  { %v1060_v5 = vmax.f32 %v1051_v6, 0.0 }
 0x19f   :  { %1283 = vmatmul.f32.gmra.mxu3 %v1060_v5 }
 0x1a7   :  { %1372 = vmatmul.f32.vlgmr.msrb.gmra.mxu3 %v1056_v29 }
 0x1aa   :  { %v1212_v39 = vpop.f32.mrf.mxu0  ;;  %v1235_v12 = vpop.f32.mrf.mxu1 }
 0x1ab   :  { %v1213_v41 = vadd.f32 %v1212_v39, %v1191_v40 }
 0x1ad   :  { %v1236_v43 = vadd.f32 %v1235_v12, %v1213_v41 }
 0x1af   :  { %1375 = vmatmul.f32.gmra.mxu3 %v1060_v5 }
 0x1b2   :  { %v1215_v42 = vpop.f32.mrf.mxu0  ;;  %v1238_v44 = vpop.f32.mrf.mxu1 }
 0x1b3   :  { %v1216_v34 = vadd.f32 %v1215_v42, %v1191_v40 }
 0x1b5   :  { %v1239_v50 = vadd.f32 %v1238_v44, %v1216_v34 }
 0x1ca   :  { %v1304_v26 = vpop.f32.mrf.mxu0  ;;  %v1327_v58 = vpop.f32.mrf.mxu1 }
 0x1cb   :  { %v1305_v54 = vadd.f32 %v1304_v26, %v1192_v52 }
 0x1cd   :  { %v1328_v62 = vadd.f32 %v1327_v58, %v1305_v54 }
 0x1d2   :  { %v1307_v63 = vpop.f32.mrf.mxu0  ;;  %v1330_v9 = vpop.f32.mrf.mxu1 }
 0x1d3   :  { %v1308_v3 = vadd.f32 %v1307_v63, %v1192_v52 }
 0x1d5   :  { %v1331_v14 = vadd.f32 %v1330_v9, %v1308_v3 }
 0x1ef   :  { %v1258_v24 = vpop.f32.mrf.mxu2 }
 0x1f0   :  { %v1259_v45 = vadd.f32 %v1258_v24, %v1236_v43 }
 0x1f8   :  { %v1261_v46 = vpop.f32.mrf.mxu2 }
 0x1f9   :  { %v1262_v21 = vadd.f32 %v1261_v46, %v1239_v50 }
 0x200   :  { %v1350_v59 = vpop.f32.mrf.mxu2 }
 0x201   :  { %v1351_v1 = vadd.f32 %v1350_v59, %v1328_v62 }
 0x208   :  { %v1353_v13 = vpop.f32.mrf.mxu2 }
 0x209   :  { %v1354_v17 = vadd.f32 %v1353_v13, %v1331_v14 }
 0x21a   :  { %v1281_v47 = vpop.f32.mrf.mxu3 }
 0x21b   :  { %v1282_v48 = vadd.f32 %v1281_v47, %v1259_v45 }
 0x21d   :  { %v1379_v49 = vmax.f32 %v1282_v48, 0.0 }
 0x21f   :  { %1383 = vst [vmem:[#allocation11] sm:$0xff] %v1379_v49 }
 0x222   :  { %v1284_v53 = vpop.f32.mrf.mxu3 }
 0x223   :  { %v1285_v55 = vadd.f32 %v1284_v53, %v1262_v21 }
 0x225   :  { %v1381_v27 = vmax.f32 %v1285_v55, 0.0 }
 0x227   :  { %1385 = vst [vmem:[#allocation11 + $0x10] sm:$0xff] %v1381_v27 }
 0x22a   :  { %v1373_v2 = vpop.f32.mrf.mxu3 }
 0x22b   :  { %v1374_v8 = vadd.f32 %v1373_v2, %v1351_v1 }
 0x22d   :  { %v1380_v11 = vmax.f32 %v1374_v8, 0.0 }
 0x22f   :  { %1384 = vst [vmem:[#allocation11 + $0x8] sm:$0xff] %v1380_v11 }
 0x232   :  { %v1376_v18 = vpop.f32.mrf.mxu3 }
 0x233   :  { %v1377_v19 = vadd.f32 %v1376_v18, %v1354_v17 }
 0x235   :  { %v1382_v20 = vmax.f32 %v1377_v19, 0.0 }
 0x237   :  { %1386 = vst [vmem:[#allocation11 + $0x18] sm:$0xff] %v1382_v20 }
 0x238   :  { %1399 = dma.vmem_to_hbm [thread:$0]  %s1392_s4, 512, %s1394_s23, [#allocation4], %s1586_s30, %s1586_s30, %s1587_s6  }
 0x239   :  { %1580 = dma.done.wait [#allocation4], 512  }
 0x23a   :  { %1581 = vsyncadd [#allocation4], 4294966784 }
 0x23b   :  { %1404 = vsyncpa [#allocation3], 1 }
 0x23c   :  { %1405 = vsyncpa [#allocation6], 1 }
 0x23d   :  { %1406 = vsyncpa [#allocation9], 1 }
 0x23e   :  { %1407 = vsyncpa [#allocation4], 1 }

</bundles_post_ra>
